<compile_context>
chip_gen: v6e
topology: v6e:2x2x1
jax: 0.10.0
libtpu: 0.0.40
codegen_flags: <defaults>
</compile_context>

<pallas_src>
import functools

import jax
import jax.numpy as jnp
from jax.experimental import pallas as pl
from jax.experimental.pallas import tpu as pltpu

LANE = 128  # all feature dims are padded to one full lane group


# ----------------------------------------------------------------------------
# Small helpers
# ----------------------------------------------------------------------------
def _round_up(x, m):
    return ((x + m - 1) // m) * m


def _pad2(a, rows, cols):
    """Zero-pad a 2-D array up to (rows, cols)."""
    out = jnp.zeros((rows, cols), a.dtype)
    return out.at[: a.shape[0], : a.shape[1]].set(a)


def _pick_tile(n_pad, target):
    """Largest multiple of 128 that divides n_pad and is <= target.
    n_pad is always a multiple of 128, so this never falls back to n_pad
    unless n_pad <= target."""
    target = max(128, min(target, n_pad))
    target -= target % 128
    for t in range(target, 0, -128):
        if n_pad % t == 0:
            return t
    return 128


def _vmem_limit_bytes():
    """Generation-aware VMEM budget: ~3/4 of physical, capped at 112 MiB.
    -> ~48 MiB on v7x (64 MiB physical), ~96 MiB on v5e/v6e (128 MiB)."""
    default = 48 << 20  # safe on every generation
    try:
        info = pltpu.get_tpu_info()
        phys = int(getattr(info, "vmem_capacity_bytes", 0) or 0)
        if phys > 0:
            return min(max((phys * 3) // 4, 32 << 20), 112 << 20)
    except Exception:
        pass
    return default


# ----------------------------------------------------------------------------
# Fused 3-layer kernel (A_hat resident in VMEM): one HBM read of A_hat total.
# All refs are full arrays in VMEM (no grid).
# ----------------------------------------------------------------------------
def fused_resgcn_kernel(a_ref, x_ref, w1, b1, w2, ws02, b2, w3, ws13, b3,
                        wl, bl, out_ref):
    a = a_ref[...]                                   # (n_pad, n_pad) bf16
    x = x_ref[...]                                   # (n_pad, 128)  bf16

    # Layer 1: relu((A @ x) @ W1 + b1)
    p1 = jnp.dot(a, x, preferred_element_type=jnp.float32)
    h1 = jnp.maximum(
        jnp.dot(p1.astype(jnp.bfloat16), w1[...],
                preferred_element_type=jnp.float32) + b1[...], 0.0)
    h1b = h1.astype(jnp.bfloat16)

    # Layer 2: relu((A @ h1) @ W2 + x @ Ws02 + (b2 + bs02))
    p2 = jnp.dot(a, h1b, preferred_element_type=jnp.float32)
    z2 = (jnp.dot(p2.astype(jnp.bfloat16), w2[...],
                  preferred_element_type=jnp.float32)
          + jnp.dot(x, ws02[...], preferred_element_type=jnp.float32)
          + b2[...])
    h2b = jnp.maximum(z2, 0.0).astype(jnp.bfloat16)

    # Layer 3: relu((A @ h2) @ W3 + h1 @ Ws13 + (b3 + bs13))
    p3 = jnp.dot(a, h2b, preferred_element_type=jnp.float32)
    z3 = (jnp.dot(p3.astype(jnp.bfloat16), w3[...],
                  preferred_element_type=jnp.float32)
          + jnp.dot(h1b, ws13[...], preferred_element_type=jnp.float32)
          + b3[...])
    h3b = jnp.maximum(z3, 0.0).astype(jnp.bfloat16)

    # Head: sigmoid(h3 @ WL + bL) in a lane-dense (n_pad, 128) slab (real
    # logit lives in column 0; column 0 is sliced out in XLA).
    logits = jnp.dot(h3b, wl[...], preferred_element_type=jnp.float32) + bl[...]
    out_ref[...] = jax.nn.sigmoid(logits)


def _fused_forward(a_bf, x_bf, pp, vmem_limit):
    n_pad = a_bf.shape[0]
    return pl.pallas_call(
        fused_resgcn_kernel,
        out_shape=jax.ShapeDtypeStruct((n_pad, LANE), jnp.float32),
        compiler_params=pltpu.CompilerParams(vmem_limit_bytes=vmem_limit),
    )(a_bf, x_bf, pp["w1"], pp["b1"], pp["w2"], pp["ws02"], pp["b2"],
      pp["w3"], pp["ws13"], pp["b3"], pp["wl"], pp["bl"])


# ----------------------------------------------------------------------------
# Tiled per-layer kernel (large-N path).
#   grid = (num_row_tiles, num_k_tiles); k is the reduction over A_hat cols.
#   refs: a_tile, h_prev, [skip_rowtile], w, [ws], b, [w_head, b_head],
#         out_rowtile, acc_scratch
# ----------------------------------------------------------------------------
def gcn_layer_kernel(*refs, has_skip, final_head, tk, h_resident):
    it = iter(refs)
    a_ref = next(it)                             # (tm, tk) bf16 streamed tile
    h_ref = next(it)                             # (n_pad,128) resident  OR (tk,128) streamed
    skip_ref = next(it) if has_skip else None    # (tm, 128) bf16 row slice
    w_ref = next(it)                             # (128, 128) bf16
    ws_ref = next(it) if has_skip else None      # (128, 128) bf16
    b_ref = next(it)                             # (1, 128) f32 (skip bias folded in)
    wl_ref = next(it) if final_head else None    # (128, 128) bf16
    bl_ref = next(it) if final_head else None    # (1, 128) f32
    out_ref = next(it)                           # (tm, 128) lane-dense output
    acc_ref = next(it)                           # (tm, 128) f32 scratch

    k = pl.program_id(1)
    nk = pl.num_programs(1)

    @pl.when(k == 0)
    def _init():
        acc_ref[...] = jnp.zeros_like(acc_ref)

    # N^2-dominant propagation term: bf16 MXU inputs, f32 accumulation.
    if h_resident:
        start = pl.multiple_of(k * tk, tk)
        h_blk = h_ref[pl.ds(start, tk), :]
    else:
        h_blk = h_ref[...]
    acc_ref[...] += jnp.dot(a_ref[...], h_blk,
                            preferred_element_type=jnp.float32)

    @pl.when(k == nk - 1)
    def _finalize():
        prop = acc_ref[...].astype(jnp.bfloat16)     # MXU operand dtype
        z = jnp.dot(prop, w_ref[...], preferred_element_type=jnp.float32)
        if has_skip:
            # Residual skip applied post-propagation (the skip is NOT
            # propagated through A_hat, matching the PyTorch module).
            z = z + jnp.dot(skip_ref[...], ws_ref[...],
                            preferred_element_type=jnp.float32)
        z = z + b_ref[...]
        h = jnp.maximum(z, 0.0)                      # ReLU in f32
        if final_head:
            # Fused Linear(16,1)+sigmoid, emitted into a lane-dense 128-wide
            # slab (logit in column 0, sliced in XLA) -> no masked stores.
            logits = jnp.dot(h.astype(jnp.bfloat16), wl_ref[...],
                             preferred_element_type=jnp.float32) + bl_ref[...]
            out_ref[...] = jax.nn.sigmoid(logits).astype(out_ref.dtype)
        else:
            out_ref[...] = h.astype(out_ref.dtype)


def _gcn_layer(a, h, skip, w, ws, b, wl, bl, *, out_dtype, tm, tk,
               h_resident, vmem_limit):
    n_pad = a.shape[0]
    assert n_pad % tm == 0 and n_pad % tk == 0, (n_pad, tm, tk)
    has_skip = skip is not None
    final_head = wl is not None

    operands = [a, h]
    in_specs = [pl.BlockSpec((tm, tk), lambda i, k: (i, k))]   # streamed A_hat
    if h_resident:
        # Whole h_prev resident in VMEM (constant block index => one DMA).
        in_specs.append(pl.BlockSpec((n_pad, LANE), lambda i, k: (0, 0)))
    else:
        in_specs.append(pl.BlockSpec((tk, LANE), lambda i, k: (k, 0)))
    if has_skip:
        operands.append(skip)
        in_specs.append(pl.BlockSpec((tm, LANE), lambda i, k: (i, 0)))
    operands.append(w)
    in_specs.append(pl.BlockSpec(w.shape, lambda i, k: (0, 0)))
    if has_skip:
        operands.append(ws)
        in_specs.append(pl.BlockSpec(ws.shape, lambda i, k: (0, 0)))
    operands.append(b)
    in_specs.append(pl.BlockSpec(b.shape, lambda i, k: (0, 0)))
    if final_head:
        operands += [wl, bl]
        in_specs += [pl.BlockSpec(wl.shape, lambda i, k: (0, 0)),
                     pl.BlockSpec(bl.shape, lambda i, k: (0, 0))]

    kernel = functools.partial(gcn_layer_kernel, has_skip=has_skip,
                               final_head=final_head, tk=tk,
                               h_resident=h_resident)

    return pl.pallas_call(
        kernel,
        out_shape=jax.ShapeDtypeStruct((n_pad, LANE), out_dtype),
        grid=(n_pad // tm, n_pad // tk),
        in_specs=in_specs,
        out_specs=pl.BlockSpec((tm, LANE), lambda i, k: (i, 0)),
        scratch_shapes=[pltpu.VMEM((tm, LANE), jnp.float32)],
        compiler_params=pltpu.CompilerParams(
            # rows independent -> megacore-parallel (2 TCs on v7x);
            # k is the A_hat reduction -> "arbitrary".
            dimension_semantics=("parallel", "arbitrary"),
            vmem_limit_bytes=vmem_limit,
        ),
    )(*operands)


# ----------------------------------------------------------------------------
# Parameter prep: fold skip biases, pad everything to 128 lanes, cast to bf16.
# ----------------------------------------------------------------------------
def _prep_params(params):
    def wpad(a):
        return _pad2(a.astype(jnp.float32), LANE, LANE).astype(jnp.bfloat16)

    def bpad(a):
        return _pad2(a.astype(jnp.float32), 1, LANE)

    return {
        "w1": wpad(params["w1"]), "b1": bpad(params["b1"]),
        "w2": wpad(params["w2"]), "ws02": wpad(params["ws02"]),
        "b2": bpad(params["b2"] + params["bs02"]),
        "w3": wpad(params["w3"]), "ws13": wpad(params["ws13"]),
        "b3": bpad(params["b3"] + params["bs13"]),
        "wl": wpad(params["wl"]), "bl": bpad(params["bl"]),
    }


def resgcn3_forward(a_hat, x, params, *, row_tile=512, k_tile=2048,
                    force_tiled=False, fused_max_n=2048, h_resident=None):
    """Full eval-mode forward.  Output shape (N, 1)."""
    n = x.shape[0]
    n_pad = _round_up(max(n, 1), LANE)
    vmem_limit = _vmem_limit_bytes()

    # bf16 at the MXU operand boundary; zero row/col padding is inert
    # (padded output rows are garbage but sliced away below).
    a_bf = _pad2(a_hat.astype(jnp.float32), n_pad, n_pad).astype(jnp.bfloat16)
    x_bf = _pad2(x.astype(jnp.float32), n_pad, LANE).astype(jnp.bfloat16)
    pp = _prep_params(params)

    a_bytes = 2 * n_pad * n_pad
    use_fused = ((not force_tiled) and n_pad <= fused_max_n
                 and 2 * a_bytes <= vmem_limit // 2)

    if use_fused:
        out = _fused_forward(a_bf, x_bf, pp, vmem_limit)
    else:
        tm = _pick_tile(n_pad, row_tile)
        tk = _pick_tile(n_pad, k_tile)
        # Keep at least 2 row tiles so the "parallel" axis can split across
        # both TensorCores on v7x.
        if n_pad // tm < 2 and n_pad >= 2 * 128:
            tm = _pick_tile(n_pad, max(128, n_pad // 2))
        if h_resident is None:
            # Resident h_prev (bf16, double-buffer-safe) if it is a small
            # fraction of the VMEM budget; otherwise stream (tk,128) slices.
            h_resident = (4 * n_pad * LANE) <= vmem_limit // 8

        # conv1 -> relu                      (dropout = identity in eval mode)
        h1 = _gcn_layer(a_bf, x_bf, None, pp["w1"], None, pp["b1"], None, None,
                        out_dtype=jnp.bfloat16, tm=tm, tk=tk,
                        h_resident=h_resident, vmem_limit=vmem_limit)
        # conv2 + skip0_2(x) -> relu
        h2 = _gcn_layer(a_bf, h1, x_bf, pp["w2"], pp["ws02"], pp["b2"],
                        None, None,
                        out_dtype=jnp.bfloat16, tm=tm, tk=tk,
                        h_resident=h_resident, vmem_limit=vmem_limit)
        # conv3 + skip1_3(h1) -> relu -> linear(16,1) -> sigmoid (head fused)
        out = _gcn_layer(a_bf, h2, h1, pp["w3"], pp["ws13"], pp["b3"],
                         pp["wl"], pp["bl"],
                         out_dtype=jnp.float32, tm=tm, tk=tk,
                         h_resident=h_resident, vmem_limit=vmem_limit)

    return out[:n, :1]


# ----------------------------------------------------------------------------
# Glue: dense normalized adjacency, deterministic graph, parameter init.
# ----------------------------------------------------------------------------
def build_norm_adjacency(edge_index, num_nodes):
    """A_hat = D^-1/2 (A + I) D^-1/2 from edge_index (2, E), src->dst.
    NOTE: duplicate edges are deduped by .set and pre-existing self-loops
    would be double-counted vs PyG gcn_norm; fine for these test graphs."""
    src, dst = edge_index[0], edge_index[1]
    a = jnp.zeros((num_nodes, num_nodes), jnp.float32)
    a = a.at[dst, src].set(1.0)          # message flows src -> dst
    a = a + jnp.eye(num_nodes, dtype=jnp.float32)
    deg = jnp.sum(a, axis=1)
    d_inv_sqrt = jnp.where(deg > 0, 1.0 / jnp.sqrt(deg), 0.0)
    return a * d_inv_sqrt[:, None] * d_inv_sqrt[None, :]


def build_ring_graph(num_nodes):
    """Deterministic undirected ring + chords (both directions)."""
    idx = jnp.arange(num_nodes, dtype=jnp.int32)
    ring_src, ring_dst = idx, (idx + 1) % num_nodes
    chord_src = idx[::4]
    chord_dst = (chord_src + num_nodes // 3 + 1) % num_nodes
    src = jnp.concatenate([ring_src, ring_dst, chord_src, chord_dst])
    dst = jnp.concatenate([ring_dst, ring_src, chord_dst, chord_src])
    return jnp.stack([src, dst], axis=0)


def init_params(key, num_features):
    """Glorot-ish init. Weights stored (in, out); biases (1, out)."""
    dims = {
        "w1":   (num_features, 64), "b1":   64,
        "ws02": (num_features, 32), "bs02": 32,
        "w2":   (64, 32),           "b2":   32,
        "ws13": (64, 16),           "bs13": 16,
        "w3":   (32, 16),           "b3":   16,
        "wl":   (16, 1),            "bl":   1,
    }
    params = {}
    keys = jax.random.split(key, 6)
    for i, name in enumerate(["w1", "ws02", "w2", "ws13", "w3", "wl"]):
        fan_in, fan_out = dims[name]
        scale = jnp.sqrt(2.0 / (fan_in + fan_out)).astype(jnp.float32)
        params[name] = scale * jax.random.normal(keys[i], (fan_in, fan_out),
                                                 dtype=jnp.float32)
    for name in ["b1", "bs02", "b2", "bs13", "b3", "bl"]:
        params[name] = jnp.zeros((1, dims[name]), jnp.float32)
    return params


# ----------------------------------------------------------------------------
# Pure-JAX f32 reference (original operation order) for correctness check.
# ----------------------------------------------------------------------------
def reference_forward(a_hat, x, p):
    gcn = lambda h, w, b: a_hat @ (h @ w) + b
    h1 = jax.nn.relu(gcn(x, p["w1"], p["b1"]))
    h2 = jax.nn.relu(gcn(h1, p["w2"], p["b2"]) + x @ p["ws02"] + p["bs02"])
    h3 = jax.nn.relu(gcn(h2, p["w3"], p["b3"]) + h1 @ p["ws13"] + p["bs13"])
    return jax.nn.sigmoid(h3 @ p["wl"] + p["bl"])


if __name__ == "__main__":
    key = jax.random.PRNGKey(0)
    k_feat, k_param, k_feat2 = jax.random.split(key, 3)

    num_features = 8
    params = init_params(k_param, num_features)

    # --- small graph: exercises the fused (A_hat-resident) path -------------
    n_small = 16
    x_s = jax.random.normal(k_feat, (n_small, num_features), dtype=jnp.float32)
    a_s = build_norm_adjacency(build_ring_graph(n_small), n_small)

    out_s = jax.block_until_ready(resgcn3_forward(a_s, x_s, params))
    ref_s = reference_forward(a_s, x_s, params)
    assert out_s.shape == (n_small, 1), out_s.shape
    err_s = float(jnp.max(jnp.abs(out_s - ref_s)))
    assert jnp.allclose(out_s, ref_s, atol=3e-2, rtol=3e-2), f"max abs err {err_s}"

    # --- medium graph: tiled path, resident h_prev, multi-step k reduction --
    n_med = 256
    x_m = jax.random.normal(k_feat2, (n_med, num_features), dtype=jnp.float32)
    a_m = build_norm_adjacency(build_ring_graph(n_med), n_med)
    ref_m = reference_forward(a_m, x_m, params)

    out_m = jax.block_until_ready(
        resgcn3_forward(a_m, x_m, params, force_tiled=True,
                        row_tile=128, k_tile=128))
    assert out_m.shape == (n_med, 1), out_m.shape
    err_m = float(jnp.max(jnp.abs(out_m - ref_m)))
    assert jnp.allclose(out_m, ref_m, atol=3e-2, rtol=3e-2), f"max abs err {err_m}"

    # --- medium graph: tiled path with the streamed-h fallback branch -------
    out_m2 = jax.block_until_ready(
        resgcn3_forward(a_m, x_m, params, force_tiled=True,
                        row_tile=128, k_tile=128, h_resident=False))
    err_m2 = float(jnp.max(jnp.abs(out_m2 - ref_m)))
    assert jnp.allclose(out_m2, ref_m, atol=3e-2, rtol=3e-2), f"max abs err {err_m2}"

    print("KERNEL_OK")
</pallas_src>

<mosaic_0001>
module attributes {stable_mosaic.version = 11 : i64} {
  func.func @fused_resgcn_kernel(%arg0: memref<128x128xbf16, #tpu.memory_space<vmem>>, %arg1: memref<128x128xbf16, #tpu.memory_space<vmem>>, %arg2: memref<128x128xbf16, #tpu.memory_space<vmem>>, %arg3: memref<1x128xf32, #tpu.memory_space<vmem>>, %arg4: memref<128x128xbf16, #tpu.memory_space<vmem>>, %arg5: memref<128x128xbf16, #tpu.memory_space<vmem>>, %arg6: memref<1x128xf32, #tpu.memory_space<vmem>>, %arg7: memref<128x128xbf16, #tpu.memory_space<vmem>>, %arg8: memref<128x128xbf16, #tpu.memory_space<vmem>>, %arg9: memref<1x128xf32, #tpu.memory_space<vmem>>, %arg10: memref<128x128xbf16, #tpu.memory_space<vmem>>, %arg11: memref<1x128xf32, #tpu.memory_space<vmem>>, %arg12: memref<128x128xf32, #tpu.memory_space<vmem>>) attributes {dimension_semantics = [], scalar_prefetch = 0 : i64, scratch_operands = 0 : i64, tpu.core_type = #tpu.core_type<tc>} {
    %c0 = arith.constant 0 : index
    %c0_0 = arith.constant 0 : index
    %0 = vector.load %arg0[%c0, %c0_0] : memref<128x128xbf16, #tpu.memory_space<vmem>>, vector<128x128xbf16>
    %c0_1 = arith.constant 0 : index
    %c0_2 = arith.constant 0 : index
    %1 = vector.load %arg1[%c0_1, %c0_2] : memref<128x128xbf16, #tpu.memory_space<vmem>>, vector<128x128xbf16>
    %cst = arith.constant dense<0.000000e+00> : vector<128x128xf32>
    %2 = tpu.matmul %0, %1, %cst {dimension_numbers = #tpu.dot_dimension_numbers<[1], [0], [0], [1], [0, 0, 1, 1], [], []>} : vector<128x128xbf16>, vector<128x128xbf16>, vector<128x128xf32> -> vector<128x128xf32>
    %3 = arith.truncf %2 : vector<128x128xf32> to vector<128x128xbf16>
    %c0_3 = arith.constant 0 : index
    %c0_4 = arith.constant 0 : index
    %4 = vector.load %arg2[%c0_3, %c0_4] : memref<128x128xbf16, #tpu.memory_space<vmem>>, vector<128x128xbf16>
    %cst_5 = arith.constant dense<0.000000e+00> : vector<128x128xf32>
    %5 = tpu.matmul %3, %4, %cst_5 {dimension_numbers = #tpu.dot_dimension_numbers<[1], [0], [0], [1], [0, 0, 1, 1], [], []>} : vector<128x128xbf16>, vector<128x128xbf16>, vector<128x128xf32> -> vector<128x128xf32>
    %c0_6 = arith.constant 0 : index
    %c0_7 = arith.constant 0 : index
    %6 = vector.load %arg3[%c0_6, %c0_7] : memref<1x128xf32, #tpu.memory_space<vmem>>, vector<1x128xf32>
    %7 = vector.broadcast %6 : vector<1x128xf32> to vector<128x128xf32>
    %8 = arith.addf %5, %7 : vector<128x128xf32>
    %cst_8 = arith.constant 0.000000e+00 : f32
    %9 = vector.broadcast %cst_8 : f32 to vector<128x128xf32>
    %10 = arith.maximumf %8, %9 : vector<128x128xf32>
    %11 = arith.truncf %10 : vector<128x128xf32> to vector<128x128xbf16>
    %cst_9 = arith.constant dense<0.000000e+00> : vector<128x128xf32>
    %12 = tpu.matmul %0, %11, %cst_9 {dimension_numbers = #tpu.dot_dimension_numbers<[1], [0], [0], [1], [0, 0, 1, 1], [], []>} : vector<128x128xbf16>, vector<128x128xbf16>, vector<128x128xf32> -> vector<128x128xf32>
    %13 = arith.truncf %12 : vector<128x128xf32> to vector<128x128xbf16>
    %c0_10 = arith.constant 0 : index
    %c0_11 = arith.constant 0 : index
    %14 = vector.load %arg4[%c0_10, %c0_11] : memref<128x128xbf16, #tpu.memory_space<vmem>>, vector<128x128xbf16>
    %cst_12 = arith.constant dense<0.000000e+00> : vector<128x128xf32>
    %15 = tpu.matmul %13, %14, %cst_12 {dimension_numbers = #tpu.dot_dimension_numbers<[1], [0], [0], [1], [0, 0, 1, 1], [], []>} : vector<128x128xbf16>, vector<128x128xbf16>, vector<128x128xf32> -> vector<128x128xf32>
    %c0_13 = arith.constant 0 : index
    %c0_14 = arith.constant 0 : index
    %16 = vector.load %arg5[%c0_13, %c0_14] : memref<128x128xbf16, #tpu.memory_space<vmem>>, vector<128x128xbf16>
    %cst_15 = arith.constant dense<0.000000e+00> : vector<128x128xf32>
    %17 = tpu.matmul %1, %16, %cst_15 {dimension_numbers = #tpu.dot_dimension_numbers<[1], [0], [0], [1], [0, 0, 1, 1], [], []>} : vector<128x128xbf16>, vector<128x128xbf16>, vector<128x128xf32> -> vector<128x128xf32>
    %18 = arith.addf %15, %17 : vector<128x128xf32>
    %c0_16 = arith.constant 0 : index
    %c0_17 = arith.constant 0 : index
    %19 = vector.load %arg6[%c0_16, %c0_17] : memref<1x128xf32, #tpu.memory_space<vmem>>, vector<1x128xf32>
    %20 = vector.broadcast %19 : vector<1x128xf32> to vector<128x128xf32>
    %21 = arith.addf %18, %20 : vector<128x128xf32>
    %cst_18 = arith.constant 0.000000e+00 : f32
    %22 = vector.broadcast %cst_18 : f32 to vector<128x128xf32>
    %23 = arith.maximumf %21, %22 : vector<128x128xf32>
    %24 = arith.truncf %23 : vector<128x128xf32> to vector<128x128xbf16>
    %cst_19 = arith.constant dense<0.000000e+00> : vector<128x128xf32>
    %25 = tpu.matmul %0, %24, %cst_19 {dimension_numbers = #tpu.dot_dimension_numbers<[1], [0], [0], [1], [0, 0, 1, 1], [], []>} : vector<128x128xbf16>, vector<128x128xbf16>, vector<128x128xf32> -> vector<128x128xf32>
    %26 = arith.truncf %25 : vector<128x128xf32> to vector<128x128xbf16>
    %c0_20 = arith.constant 0 : index
    %c0_21 = arith.constant 0 : index
    %27 = vector.load %arg7[%c0_20, %c0_21] : memref<128x128xbf16, #tpu.memory_space<vmem>>, vector<128x128xbf16>
    %cst_22 = arith.constant dense<0.000000e+00> : vector<128x128xf32>
    %28 = tpu.matmul %26, %27, %cst_22 {dimension_numbers = #tpu.dot_dimension_numbers<[1], [0], [0], [1], [0, 0, 1, 1], [], []>} : vector<128x128xbf16>, vector<128x128xbf16>, vector<128x128xf32> -> vector<128x128xf32>
    %c0_23 = arith.constant 0 : index
    %c0_24 = arith.constant 0 : index
    %29 = vector.load %arg8[%c0_23, %c0_24] : memref<128x128xbf16, #tpu.memory_space<vmem>>, vector<128x128xbf16>
    %cst_25 = arith.constant dense<0.000000e+00> : vector<128x128xf32>
    %30 = tpu.matmul %11, %29, %cst_25 {dimension_numbers = #tpu.dot_dimension_numbers<[1], [0], [0], [1], [0, 0, 1, 1], [], []>} : vector<128x128xbf16>, vector<128x128xbf16>, vector<128x128xf32> -> vector<128x128xf32>
    %31 = arith.addf %28, %30 : vector<128x128xf32>
    %c0_26 = arith.constant 0 : index
    %c0_27 = arith.constant 0 : index
    %32 = vector.load %arg9[%c0_26, %c0_27] : memref<1x128xf32, #tpu.memory_space<vmem>>, vector<1x128xf32>
    %33 = vector.broadcast %32 : vector<1x128xf32> to vector<128x128xf32>
    %34 = arith.addf %31, %33 : vector<128x128xf32>
    %cst_28 = arith.constant 0.000000e+00 : f32
    %35 = vector.broadcast %cst_28 : f32 to vector<128x128xf32>
    %36 = arith.maximumf %34, %35 : vector<128x128xf32>
    %37 = arith.truncf %36 : vector<128x128xf32> to vector<128x128xbf16>
    %c0_29 = arith.constant 0 : index
    %c0_30 = arith.constant 0 : index
    %38 = vector.load %arg10[%c0_29, %c0_30] : memref<128x128xbf16, #tpu.memory_space<vmem>>, vector<128x128xbf16>
    %cst_31 = arith.constant dense<0.000000e+00> : vector<128x128xf32>
    %39 = tpu.matmul %37, %38, %cst_31 {dimension_numbers = #tpu.dot_dimension_numbers<[1], [0], [0], [1], [0, 0, 1, 1], [], []>} : vector<128x128xbf16>, vector<128x128xbf16>, vector<128x128xf32> -> vector<128x128xf32>
    %c0_32 = arith.constant 0 : index
    %c0_33 = arith.constant 0 : index
    %40 = vector.load %arg11[%c0_32, %c0_33] : memref<1x128xf32, #tpu.memory_space<vmem>>, vector<1x128xf32>
    %41 = vector.broadcast %40 : vector<1x128xf32> to vector<128x128xf32>
    %42 = arith.addf %39, %41 : vector<128x128xf32>
    %43 = arith.negf %42 : vector<128x128xf32>
    %44 = math.exp %43 : vector<128x128xf32>
    %cst_34 = arith.constant 1.000000e+00 : f32
    %45 = vector.broadcast %cst_34 : f32 to vector<128x128xf32>
    %46 = arith.addf %45, %44 : vector<128x128xf32>
    %47 = arith.divf %45, %46 : vector<128x128xf32>
    %c0_35 = arith.constant 0 : index
    %c0_36 = arith.constant 0 : index
    %48 = vector.load %arg12[%c0_35, %c0_36] : memref<128x128xf32, #tpu.memory_space<vmem>>, vector<128x128xf32>
    tpu.vector_store %arg12[%c0_35, %c0_36], %47 {strides = array<i32>} : memref<128x128xf32, #tpu.memory_space<vmem>>, vector<128x128xf32>,
    return
  }
}

</mosaic_0001>

<bundles_post_ra>
// kernel: tpu_custom_call.1
= control target key start
LH: loop header
LB: loop body
LE: loop exit
PB: predicated region body
PF: predicated region fallthrough
CT: control target
= control target key end

     0   :  { %17 = vsyncpa [#allocation3], 0  ;;  %s3030_s0 = inlined_call_operand.hbm [shape: bf16[128,128], index: 0, kind: input, shape index: {}]   ;;  %s3031_s1 = inlined_call_operand.hbm [shape: bf16[128,128], index: 1, kind: input, shape index: {}]   ;;  %s3032_s2 = inlined_call_operand.hbm [shape: bf16[128,128], index: 2, kind: input, shape index: {}]   ;;  %s3033_s3 = inlined_call_operand.vmem [shape: f32[1,128], index: 3, kind: input, shape index: {}]   ;;  %s3034_s4 = inlined_call_operand.hbm [shape: bf16[128,128], index: 4, kind: input, shape index: {}]   ;;  %s3035_s5 = inlined_call_operand.hbm [shape: bf16[128,128], index: 5, kind: input, shape index: {}]   ;;  %s3036_s6 = inlined_call_operand.vmem [shape: f32[1,128], index: 6, kind: input, shape index: {}]   ;;  %s3037_s7 = inlined_call_operand.hbm [shape: bf16[128,128], index: 7, kind: input, shape index: {}]   ;;  %s3038_s8 = inlined_call_operand.hbm [shape: bf16[128,128], index: 8, kind: input, shape index: {}]   ;;  %s3039_s9 = inlined_call_operand.vmem [shape: f32[1,128], index: 9, kind: input, shape index: {}]   ;;  %s3040_s10 = inlined_call_operand.hbm [shape: bf16[128,128], index: 10, kind: input, shape index: {}]   ;;  %s3041_s11 = inlined_call_operand.vmem [shape: f32[1,128], index: 11, kind: input, shape index: {}]   ;;  %s3042_s12 = inlined_call_operand.hbm [shape: f32[128,128], index: 12, kind: output, shape index: {}]  }
   0x1   :  { %18 = vsyncpa [#allocation6], 0 }
   0x2   :  { %19 = vsyncpa [#allocation9], 0 }
   0x3   :  { %20 = vsyncpa [#allocation12], 0 }
   0x4   :  { %21 = vsyncpa [#allocation15], 0 }
   0x5   :  { %22 = vsyncpa [#allocation4], 0  ;;  %s2691_s21 = smov [#allocation5]   ;;  %s2692_s23 = smov [#allocation8]  }
   0x6   :  { %s40_s22 = sshll.u32 %s2691_s21, 4  ;;  %s66_s24 = sshll.u32 %s2692_s23, 4  ;;  %s41_s22 = int_to_ptr.vmem [resolvable:$true] %s40_s22  ;;  %s67_s24 = int_to_ptr.vmem [resolvable:$true] %s66_s24 }
   0x7   :  { %s2507_s25 = scalar_lea.vmem %s41_s22, 1024  ;;  %p2512_p1 = scmp.lt.s32.totalorder %s41_s22, %s41_s22 }
   0x8   :  { %p2508_p0 = scmp.ne.s32.totalorder %s41_s22, %s2507_s25  ;;  %p2513_p2 = scmp.lt.s32.totalorder %s2507_s25, %s2507_s25 }
   0xa   :  { %p2514_p3 = por %p2513_p2, %p2512_p1 }
   0xc   :  { %p2515_p4 = pnand %p2514_p3, %p2508_p0 }
   0xe   :  { %2518 = shalt.err (!%p2515_p4)
}
   0xf   :  { %s2693_s26 = smov 64   ;;  %s2694_s27 = smov 4  }
  0x10   :  { %46 = dma.hbm_to_vmem [thread:$0]  %s3031_s1, 1024, %s41_s22, [#allocation6], %s2693_s26, %s2693_s26, %s2694_s27  }
  0x11   :  { %s2527_s30 = scalar_lea.vmem %s67_s24, 1024  ;;  %p2532_p6 = scmp.lt.s32.totalorder %s67_s24, %s67_s24 }
  0x12   :  { %p2528_p5 = scmp.ne.s32.totalorder %s67_s24, %s2527_s30  ;;  %p2533_p7 = scmp.lt.s32.totalorder %s2527_s30, %s2527_s30 }
  0x14   :  { %p2534_p8 = por %p2533_p7, %p2532_p6 }
  0x16   :  { %p2535_p9 = pnand %p2534_p8, %p2528_p5 }
  0x18   :  { %2538 = shalt.err (!%p2535_p9)
}
  0x19   :  { %72 = dma.hbm_to_vmem [thread:$0]  %s3034_s4, 1024, %s67_s24, [#allocation9], %s2693_s26, %s2693_s26, %s2694_s27  }
  0x1a   :  { %s2695_s15 = smov [#allocation11]   ;;  %s2696_s17 = smov [#allocation2]  }
  0x1b   :  { %s92_s16 = sshll.u32 %s2695_s15, 4  ;;  %s28_s18 = sshll.u32 %s2696_s17, 4  ;;  %s93_s16 = int_to_ptr.vmem [resolvable:$true] %s92_s16  ;;  %s29_s18 = int_to_ptr.vmem [resolvable:$true] %s28_s18 }
  0x1c   :  { %s2547_s1 = scalar_lea.vmem %s93_s16, 1024  ;;  %p2552_p11 = scmp.lt.s32.totalorder %s93_s16, %s93_s16 }
  0x1d   :  { %p2548_p10 = scmp.ne.s32.totalorder %s93_s16, %s2547_s1  ;;  %p2553_p12 = scmp.lt.s32.totalorder %s2547_s1, %s2547_s1 }
  0x1f   :  { %p2554_p13 = por %p2553_p12, %p2552_p11 }
  0x21   :  { %p2555_p0 = pnand %p2554_p13, %p2548_p10 }
  0x23   :  { %2558 = shalt.err (!%p2555_p0)
}
  0x24   :  { %98 = dma.hbm_to_vmem [thread:$0]  %s3037_s7, 1024, %s93_s16, [#allocation12], %s2693_s26, %s2693_s26, %s2694_s27  }
  0x25   :  { %s2567_s4 = scalar_lea.vmem %s29_s18, 1024  ;;  %p2572_p2 = scmp.lt.s32.totalorder %s29_s18, %s29_s18 }
  0x26   :  { %p2568_p1 = scmp.ne.s32.totalorder %s29_s18, %s2567_s4  ;;  %p2573_p3 = scmp.lt.s32.totalorder %s2567_s4, %s2567_s4 }
  0x28   :  { %p2574_p4 = por %p2573_p3, %p2572_p2 }
  0x2a   :  { %p2575_p5 = pnand %p2574_p4, %p2568_p1 }
  0x2c   :  { %2578 = shalt.err (!%p2575_p5)
}
  0x2d   :  { %34 = dma.hbm_to_vmem [thread:$0]  %s3030_s0, 1024, %s29_s18, [#allocation3], %s2693_s26, %s2693_s26, %s2694_s27  }
  0x2e   :  { %s2697_s23 = smov [#allocation7]   ;;  %s2698_s25 = smov [#allocation10]  }
  0x2f   :  { %s52_s24 = sshll.u32 %s2697_s23, 4  ;;  %s78_s28 = sshll.u32 %s2698_s25, 4  ;;  %s53_s24 = int_to_ptr.vmem [resolvable:$true] %s52_s24  ;;  %s79_s28 = int_to_ptr.vmem [resolvable:$true] %s78_s28 }
  0x30   :  { %s2587_s7 = scalar_lea.vmem %s53_s24, 1024  ;;  %p2592_p7 = scmp.lt.s32.totalorder %s53_s24, %s53_s24 }
  0x31   :  { %p2588_p6 = scmp.ne.s32.totalorder %s53_s24, %s2587_s7  ;;  %p2593_p8 = scmp.lt.s32.totalorder %s2587_s7, %s2587_s7 }
  0x33   :  { %p2594_p9 = por %p2593_p8, %p2592_p7 }
  0x35   :  { %p2595_p10 = pnand %p2594_p9, %p2588_p6 }
  0x37   :  { %2598 = shalt.err (!%p2595_p10)
}
  0x38   :  { %58 = dma.hbm_to_vmem [thread:$0]  %s3032_s2, 1024, %s53_s24, [#allocation6], %s2693_s26, %s2693_s26, %s2694_s27  }
  0x39   :  { %s2607_s0 = scalar_lea.vmem %s79_s28, 1024  ;;  %p2612_p12 = scmp.lt.s32.totalorder %s79_s28, %s79_s28 }
  0x3a   :  { %p2608_p11 = scmp.ne.s32.totalorder %s79_s28, %s2607_s0  ;;  %p2613_p13 = scmp.lt.s32.totalorder %s2607_s0, %s2607_s0 }
  0x3c   :  { %p2614_p0 = por %p2613_p13, %p2612_p12 }
  0x3e   :  { %p2615_p1 = pnand %p2614_p0, %p2608_p11 }
  0x40   :  { %2618 = shalt.err (!%p2615_p1)
}
  0x41   :  { %84 = dma.hbm_to_vmem [thread:$0]  %s3035_s5, 1024, %s79_s28, [#allocation9], %s2693_s26, %s2693_s26, %s2694_s27  }
  0x42   :  { %s2699_s15 = smov [#allocation13]   ;;  %s2700_s17 = smov [#allocation14]  }
  0x43   :  { %s104_s16 = sshll.u32 %s2699_s15, 4  ;;  %s118_s18 = sshll.u32 %s2700_s17, 4  ;;  %s105_s16 = int_to_ptr.vmem [resolvable:$true] %s104_s16  ;;  %s119_s18 = int_to_ptr.vmem [resolvable:$true] %s118_s18 }
  0x44   :  { %s2627_s2 = scalar_lea.vmem %s105_s16, 1024  ;;  %p2632_p3 = scmp.lt.s32.totalorder %s105_s16, %s105_s16 }
  0x45   :  { %p2628_p2 = scmp.ne.s32.totalorder %s105_s16, %s2627_s2  ;;  %p2633_p4 = scmp.lt.s32.totalorder %s2627_s2, %s2627_s2 }
  0x47   :  { %p2634_p5 = por %p2633_p4, %p2632_p3 }
  0x49   :  { %p2635_p6 = pnand %p2634_p5, %p2628_p2 }
  0x4b   :  { %2638 = shalt.err (!%p2635_p6)
}
  0x4c   :  { %110 = dma.hbm_to_vmem [thread:$0]  %s3038_s8, 1024, %s105_s16, [#allocation12], %s2693_s26, %s2693_s26, %s2694_s27  }
  0x4d   :  { %s2647_s5 = scalar_lea.vmem %s119_s18, 1024  ;;  %p2652_p8 = scmp.lt.s32.totalorder %s119_s18, %s119_s18 }
  0x4e   :  { %p2648_p7 = scmp.ne.s32.totalorder %s119_s18, %s2647_s5  ;;  %p2653_p9 = scmp.lt.s32.totalorder %s2647_s5, %s2647_s5 }
  0x50   :  { %p2654_p10 = por %p2653_p9, %p2652_p8 }
  0x52   :  { %p2655_p11 = pnand %p2654_p10, %p2648_p7 }
  0x54   :  { %2658 = shalt.err (!%p2655_p11)
}
  0x55   :  { %124 = dma.hbm_to_vmem [thread:$0]  %s3040_s10, 1024, %s119_s18, [#allocation15], %s2693_s26, %s2693_s26, %s2694_s27  }
  0x56   :  { %2679 = dma.done.wait [#allocation3], 1024  }
  0x57   :  { %2680 = vsyncadd [#allocation3], 4294966272 }
  0x58   :  { %2681 = dma.done.wait [#allocation6], 2048  }
  0x59   :  { %2682 = vsyncadd [#allocation6], 4294965248 }
  0x5a   :  { %2683 = dma.done.wait [#allocation9], 2048  }
  0x5b   :  { %2684 = vsyncadd [#allocation9], 4294965248 }
  0x5c   :  { %2685 = dma.done.wait [#allocation12], 2048  }
  0x5d   :  { %2686 = vsyncadd [#allocation12], 4294965248 }
  0x5e   :  { %2687 = dma.done.wait [#allocation15], 1024  }
  0x5f   :  { %2688 = vsyncadd [#allocation15], 4294966272  ;;  %v2817_v0 = vld [vmem:[#allocation5 + $0x38] sm:$0xff]   ;;  %v2819_v1 = vld [vmem:[#allocation5 + $0x30] sm:$0xff]  }
  0x60   :  { %2054 = vmatprep.subr.bf16.mxu0 %v2817_v0  ;;  %v2824_v2 = vld [vmem:[#allocation5 + $0x28] sm:$0xff]   ;;  %v2827_v3 = vld [vmem:[#allocation5 + $0x20] sm:$0xff]   ;;  %v2835_v5 = vld [vmem:[#allocation5 + $0x18] sm:$0xff]  }
  0x61   :  { %2055 = vmatpush3.bf16.msra.mxu0 %v2817_v0  ;;  %v2830_v4 = vld [vmem:[#allocation2] sm:$0xff]   ;;  %v2838_v6 = vld [vmem:[#allocation5 + $0x10] sm:$0xff]   ;;  %v2387_v7 = vld [vmem:[#allocation7 + $0x38] sm:$0xff]  }
  0x62   :  { %2056 = vmatprep.subr.bf16.mxu0 %v2819_v1  ;;  %2070 = vmatprep.mubr.bf16.mxu0 %v2830_v4  ;;  %v2388_v8 = vld [vmem:[#allocation7 + $0x30] sm:$0xff]   ;;  %v2842_v9 = vld [vmem:[#allocation5 + $0x8] sm:$0xff]   ;;  %v2845_v11 = vld [vmem:[#allocation5] sm:$0xff]  }
  0x63   :  { %2086 = vmatprep.subr.bf16.mxu1 %v2387_v7  ;;  %v2389_v10 = vld [vmem:[#allocation7 + $0x28] sm:$0xff]   ;;  %v2390_v12 = vld [vmem:[#allocation7 + $0x20] sm:$0xff]   ;;  %v2391_v13 = vld [vmem:[#allocation7 + $0x18] sm:$0xff]  }
  0x64   :  { %2087 = vmatpush3.bf16.msra.mxu1 %v2387_v7  ;;  %v2851_v14 = vld [vmem:[#allocation2 + $0x8] sm:$0xff]   ;;  %v2853_v15 = vld [vmem:[#allocation2 + $0x10] sm:$0xff]   ;;  %v2858_v17 = vld [vmem:[#allocation2 + $0x18] sm:$0xff]  }
  0x65   :  { %2057 = vmatpush3.bf16.msra.mxu0 %v2819_v1  ;;  %2088 = vmatprep.subr.bf16.mxu1 %v2388_v8  ;;  %v2392_v16 = vld [vmem:[#allocation7 + $0x10] sm:$0xff]   ;;  %v2860_v18 = vld [vmem:[#allocation2 + $0x20] sm:$0xff]   ;;  %v2864_v19 = vld [vmem:[#allocation2 + $0x28] sm:$0xff]  }
  0x66   :  { %2058 = vmatprep.subr.bf16.mxu0 %v2824_v2  ;;  %v2866_v20 = vld [vmem:[#allocation2 + $0x30] sm:$0xff]   ;;  %v2870_v21 = vld [vmem:[#allocation2 + $0x38] sm:$0xff]   ;;  %v2393_v22 = vld [vmem:[#allocation7 + $0x8] sm:$0xff]  }
  0x67   :  { %v2394_v23 = vld [vmem:[#allocation7] sm:$0xff]   ;;  %v2395_v48 = vld [vmem:[#allocation10 + $0x38] sm:$0xff]   ;;  %v2396_v49 = vld [vmem:[#allocation10 + $0x30] sm:$0xff]  }
  0x68   :  { %2089 = vmatpush3.bf16.msra.mxu1 %v2388_v8  ;;  %v2398_v50 = vld [vmem:[#allocation10 + $0x28] sm:$0xff]   ;;  %v2400_v51 = vld [vmem:[#allocation10 + $0x20] sm:$0xff]   ;;  %v2402_v52 = vld [vmem:[#allocation10 + $0x18] sm:$0xff]  }
  0x69   :  { %2059 = vmatpush3.bf16.msra.mxu0 %v2824_v2  ;;  %2090 = vmatprep.subr.bf16.mxu1 %v2389_v10  ;;  %v2404_v53 = vld [vmem:[#allocation10 + $0x10] sm:$0xff]   ;;  %v2406_v54 = vld [vmem:[#allocation10 + $0x8] sm:$0xff]  }
  0x6a   :  { %2060 = vmatprep.subr.bf16.mxu0 %v2827_v3 }
  0x6c   :  { %2091 = vmatpush3.bf16.msra.mxu1 %v2389_v10 }
  0x6d   :  { %2061 = vmatpush3.bf16.msra.mxu0 %v2827_v3  ;;  %2092 = vmatprep.subr.bf16.mxu1 %v2390_v12 }
  0x6e   :  { %2062 = vmatprep.subr.bf16.mxu0 %v2835_v5 }
  0x70   :  { %2093 = vmatpush3.bf16.msra.mxu1 %v2390_v12  ;;  %v1842_v12 = vld [vmem:[%s3033_s3] ss:$0 sm:$0xff] }
  0x71   :  { %2063 = vmatpush3.bf16.msra.mxu0 %v2835_v5  ;;  %2094 = vmatprep.subr.bf16.mxu1 %v2391_v13 }
  0x72   :  { %2064 = vmatprep.subr.bf16.mxu0 %v2838_v6 }
  0x74   :  { %2095 = vmatpush3.bf16.msra.mxu1 %v2391_v13 }
  0x75   :  { %2065 = vmatpush3.bf16.msra.mxu0 %v2838_v6  ;;  %2096 = vmatprep.subr.bf16.mxu1 %v2392_v16 }
  0x76   :  { %2066 = vmatprep.subr.bf16.mxu0 %v2842_v9 }
  0x78   :  { %2097 = vmatpush3.bf16.msra.mxu1 %v2392_v16 }
  0x79   :  { %2067 = vmatpush3.bf16.msra.mxu0 %v2842_v9  ;;  %2098 = vmatprep.subr.bf16.mxu1 %v2393_v22 }
  0x7a   :  { %2068 = vmatprep.subr.bf16.mxu0 %v2845_v11 }
  0x7c   :  { %2099 = vmatpush3.bf16.msra.mxu1 %v2393_v22 }
  0x7d   :  { %2069 = vmatpush3.bf16.msra.mxu0 %v2845_v11  ;;  %2100 = vmatprep.subr.bf16.mxu1 %v2394_v23 }
  0x80   :  { %2071 = vmatmul.mubr.bf16.vlgmr.msra.gmra.mxu0 %v2851_v14  ;;  %2101 = vmatpush3.bf16.msra.mxu1 %v2394_v23 }
  0x81   :  { %2074 = vmatprep.mubr.bf16.mxu0 %v2853_v15  ;;  %2150 = vmatprep.subr.bf16.mxu1 %v2395_v48 }
  0x88   :  { %2075 = vmatmul.mubr.bf16.gmra.mxu0 %v2858_v17 }
  0x89   :  { %2078 = vmatprep.mubr.bf16.mxu0 %v2860_v18 }
  0x90   :  { %2079 = vmatmul.mubr.bf16.gmra.mxu0 %v2864_v19 }
  0x91   :  { %2082 = vmatprep.mubr.bf16.mxu0 %v2866_v20 }
  0x98   :  { %2083 = vmatmul.mubr.bf16.gmra.mxu0 %v2870_v21 }
  0x99   :  { %2134 = vmatprep.mubr.bf16.mxu0 %v2830_v4 }
 0x140   :  { %v2072_v24 = vpop.f32.mrf.mxu0 }
 0x142   :  { %v314_v25 = vpop.f32.mrf.mxu0 }
 0x144   :  { %v2073_v26 = vpop.f32.mrf.mxu0 }
 0x145   :  { %v378_v29 = vpack.c.bf16 %v2073_v26, %v2072_v24 }
 0x146   :  { %v317_v27 = vpop.f32.mrf.mxu0 }
 0x147   :  { %v377_v28 = vpack.c.bf16 %v317_v27, %v314_v25 }
 0x148   :  { %v2076_v30 = vpop.f32.mrf.mxu0 }
 0x149   :  { %2102 = vmatprep.mubr.bf16.mxu1 %v377_v28 }
 0x14a   :  { %v330_v31 = vpop.f32.mrf.mxu0  ;;  %2103 = vmatmul.mubr.bf16.vlgmr.msra.gmra.mxu1 %v378_v29 }
 0x14b   :  { %2151 = vmatpush3.bf16.msra.mxu1 %v2395_v48 }
 0x14c   :  { %v2077_v32 = vpop.f32.mrf.mxu0  ;;  %2152 = vmatprep.subr.bf16.mxu1 %v2396_v49 }
 0x14d   :  { %v380_v35 = vpack.c.bf16 %v2077_v32, %v2076_v30 }
 0x14e   :  { %v333_v33 = vpop.f32.mrf.mxu0 }
 0x14f   :  { %v379_v34 = vpack.c.bf16 %v333_v33, %v330_v31  ;;  %2153 = vmatpush3.bf16.msra.mxu1 %v2396_v49 }
 0x150   :  { %v2080_v36 = vpop.f32.mrf.mxu0  ;;  %2154 = vmatprep.subr.bf16.mxu1 %v2398_v50 }
 0x151   :  { %2106 = vmatprep.mubr.bf16.mxu1 %v379_v34 }
 0x152   :  { %v346_v37 = vpop.f32.mrf.mxu0  ;;  %2107 = vmatmul.mubr.bf16.gmra.mxu1 %v380_v35 }
 0x153   :  { %2155 = vmatpush3.bf16.msra.mxu1 %v2398_v50 }
 0x154   :  { %v2081_v38 = vpop.f32.mrf.mxu0  ;;  %2156 = vmatprep.subr.bf16.mxu1 %v2400_v51 }
 0x155   :  { %v382_v41 = vpack.c.bf16 %v2081_v38, %v2080_v36 }
 0x156   :  { %v349_v39 = vpop.f32.mrf.mxu0 }
 0x157   :  { %v381_v40 = vpack.c.bf16 %v349_v39, %v346_v37  ;;  %2157 = vmatpush3.bf16.msra.mxu1 %v2400_v51 }
 0x158   :  { %v2084_v42 = vpop.f32.mrf.mxu0  ;;  %2158 = vmatprep.subr.bf16.mxu1 %v2402_v52 }
 0x159   :  { %2110 = vmatprep.mubr.bf16.mxu1 %v381_v40 }
 0x15a   :  { %v362_v43 = vpop.f32.mrf.mxu0  ;;  %2111 = vmatmul.mubr.bf16.gmra.mxu1 %v382_v41 }
 0x15b   :  { %2159 = vmatpush3.bf16.msra.mxu1 %v2402_v52 }
 0x15c   :  { %v2085_v44 = vpop.f32.mrf.mxu0  ;;  %2160 = vmatprep.subr.bf16.mxu1 %v2404_v53 }
 0x15d   :  { %v384_v47 = vpack.c.bf16 %v2085_v44, %v2084_v42 }
 0x15e   :  { %v365_v45 = vpop.f32.mrf.mxu0 }
 0x15f   :  { %v383_v46 = vpack.c.bf16 %v365_v45, %v362_v43  ;;  %2161 = vmatpush3.bf16.msra.mxu1 %v2404_v53 }
 0x160   :  { %2162 = vmatprep.subr.bf16.mxu1 %v2406_v54 }
 0x161   :  { %2114 = vmatprep.mubr.bf16.mxu1 %v383_v46 }
 0x162   :  { %2115 = vmatmul.mubr.bf16.gmra.mxu1 %v384_v47 }
 0x163   :  { %2166 = vmatprep.mubr.bf16.mxu1 %v2845_v11  ;;  %2163 = vmatpush3.bf16.msra.mxu1 %v2406_v54 }
 0x20a   :  { %v2104_v55 = vpop.f32.mrf.mxu1 }
 0x20b   :  { %v499_v52 = vadd.f32 %v2104_v55, %v1842_v12 }
 0x20c   :  { %v490_v56 = vpop.f32.mrf.mxu1 }
 0x20e   :  { %v2105_v57 = vpop.f32.mrf.mxu1 }
 0x20f   :  { %v502_v49 = vadd.f32 %v2105_v57, %v1842_v12 }
 0x210   :  { %v493_v58 = vpop.f32.mrf.mxu1 }
 0x211   :  { %v556_v54 = vmax.f32 %v502_v49, 0.0 }
 0x212   :  { %v2108_v59 = vpop.f32.mrf.mxu1 }
 0x213   :  { %v515_v42 = vadd.f32 %v2108_v59, %v1842_v12  ;;  %v494_v59 = vadd.f32 %v1842_v12, %v493_v58  ;;  %v2397_v58 = vld [vmem:[#allocation8 + $0x38] sm:$0xff]  }
 0x214   :  { %v506_v60 = vpop.f32.mrf.mxu1 }
 0x215   :  { %v559_v47 = vmax.f32 %v515_v42, 0.0  ;;  %v507_v48 = vadd.f32 %v1842_v12, %v506_v60  ;;  %v491_v60 = vadd.f32 %v1842_v12, %v490_v56  ;;  %v2399_v56 = vld [vmem:[#allocation8 + $0x30] sm:$0xff]  }
 0x216   :  { %v2109_v61 = vpop.f32.mrf.mxu1  ;;  %v2416_v42 = vld [vmem:[#allocation13 + $0x10] sm:$0xff]  }
 0x217   :  { %v518_v39 = vadd.f32 %v2109_v61, %v1842_v12  ;;  %v557_v53 = vmax.f32 %v507_v48, 0.0 }
 0x218   :  { %v509_v62 = vpop.f32.mrf.mxu1 }
 0x219   :  { %v560_v44 = vmax.f32 %v518_v39, 0.0  ;;  %v510_v45 = vadd.f32 %v1842_v12, %v509_v62  ;;  %v555_v62 = vmax.f32 %v499_v52, 0.0 }
 0x21a   :  { %v2112_v63 = vpop.f32.mrf.mxu1 }
 0x21b   :  { %v531_v30 = vadd.f32 %v2112_v63, %v1842_v12  ;;  %v2893_v50 = vpack.c.bf16 %v560_v44, %v559_v47  ;;  %v558_v51 = vmax.f32 %v510_v45, 0.0  ;;  %v2901_v57 = vpack.c.bf16 %v556_v54, %v555_v62  ;;  %v2417_v45 = vld [vmem:[#allocation13 + $0x8] sm:$0xff]  }
 0x21c   :  { %v522_v7 = vpop.f32.mrf.mxu1  ;;  %v554_v63 = vmax.f32 %v494_v59, 0.0 }
 0x21d   :  { %v563_v37 = vmax.f32 %v531_v30, 0.0  ;;  %v523_v38 = vadd.f32 %v1842_v12, %v522_v7  ;;  %v2897_v61 = vpack.c.bf16 %v558_v51, %v557_v53  ;;  %v553_v7 = vmax.f32 %v491_v60, 0.0  ;;  %v2418_v51 = vld [vmem:[#allocation13] sm:$0xff]  }
 0x21e   :  { %v2113_v8 = vpop.f32.mrf.mxu1 }
 0x21f   :  { %v534_v26 = vadd.f32 %v2113_v8, %v1842_v12  ;;  %v561_v43 = vmax.f32 %v523_v38, 0.0  ;;  %v2905_v55 = vpack.c.bf16 %v554_v63, %v553_v7  ;;  %v2401_v8 = vld [vmem:[#allocation8 + $0x28] sm:$0xff]  }
 0x220   :  { %v525_v10 = vpop.f32.mrf.mxu1 }
 0x221   :  { %v564_v34 = vmax.f32 %v534_v26, 0.0  ;;  %v526_v35 = vadd.f32 %v1842_v12, %v525_v10  ;;  %v2403_v10 = vld [vmem:[#allocation8 + $0x20] sm:$0xff]  }
 0x222   :  { %v2116_v11 = vpop.f32.mrf.mxu1 }
 0x223   :  { %v547_v16 = vadd.f32 %v2116_v11, %v1842_v12  ;;  %v2885_v40 = vpack.c.bf16 %v564_v34, %v563_v37  ;;  %v562_v41 = vmax.f32 %v526_v35, 0.0  ;;  %v2405_v11 = vld [vmem:[#allocation8 + $0x18] sm:$0xff]  }
 0x224   :  { %v538_v13 = vpop.f32.mrf.mxu1  ;;  %v2415_v35 = vld [vmem:[#allocation13 + $0x18] sm:$0xff]  }
 0x225   :  { %v539_v23 = vadd.f32 %v1842_v12, %v538_v13  ;;  %v567_v27 = vmax.f32 %v547_v16, 0.0  ;;  %v2889_v46 = vpack.c.bf16 %v562_v41, %v561_v43  ;;  %v2408_v13 = vld [vmem:[#allocation10] sm:$0xff]   ;;  %v2409_v16 = vld [vmem:[#allocation8 + $0x8] sm:$0xff]  }
 0x226   :  { %v2117_v22 = vpop.f32.mrf.mxu1  ;;  %2164 = vmatprep.subr.bf16.mxu1 %v2408_v13 }
 0x227   :  { %v550_v24 = vadd.f32 %v2117_v22, %v1842_v12  ;;  %v565_v31 = vmax.f32 %v539_v23, 0.0  ;;  %2165 = vmatpush3.bf16.msra.mxu1 %v2408_v13  ;;  %v2410_v22 = vld [vmem:[#allocation8] sm:$0xff]   ;;  %v2411_v23 = vld [vmem:[#allocation13 + $0x38] sm:$0xff]  }
 0x228   :  { %v541_v25 = vpop.f32.mrf.mxu1 }
 0x229   :  { %v568_v28 = vmax.f32 %v550_v24, 0.0  ;;  %v542_v29 = vadd.f32 %v1842_v12, %v541_v25  ;;  %v2407_v12 = vld [vmem:[#allocation8 + $0x10] sm:$0xff]  }
 0x22a   :  { %2167 = vmatmul.mubr.bf16.vlgmr.msra.gmra.mxu1 %v2842_v9 }
 0x22b   :  { %v2878_v32 = vpack.c.bf16 %v568_v28, %v567_v27  ;;  %v566_v33 = vmax.f32 %v542_v29, 0.0  ;;  %2170 = vmatprep.mubr.bf16.mxu1 %v2838_v6  ;;  %v2412_v29 = vld [vmem:[#allocation13 + $0x30] sm:$0xff]  }
 0x22d   :  { %v2880_v36 = vpack.c.bf16 %v566_v33, %v565_v31  ;;  %2118 = vmatprep.subr.bf16.mxu0 %v2878_v32  ;;  %v2414_v31 = vld [vmem:[#allocation13 + $0x20] sm:$0xff]  }
 0x22e   :  { %2119 = vmatpush3.bf16.msra.mxu0 %v2878_v32 }
 0x22f   :  { %2120 = vmatprep.subr.bf16.mxu0 %v2880_v36 }
 0x232   :  { %2121 = vmatpush3.bf16.msra.mxu0 %v2880_v36  ;;  %2171 = vmatmul.mubr.bf16.gmra.mxu1 %v2835_v5 }
 0x233   :  { %2122 = vmatprep.subr.bf16.mxu0 %v2885_v40  ;;  %2174 = vmatprep.mubr.bf16.mxu1 %v2827_v3 }
 0x236   :  { %2123 = vmatpush3.bf16.msra.mxu0 %v2885_v40 }
 0x237   :  { %2124 = vmatprep.subr.bf16.mxu0 %v2889_v46 }
 0x23a   :  { %2125 = vmatpush3.bf16.msra.mxu0 %v2889_v46  ;;  %2175 = vmatmul.mubr.bf16.gmra.mxu1 %v2824_v2  ;;  %v2413_v2 = vld [vmem:[#allocation13 + $0x28] sm:$0xff]  }
 0x23b   :  { %2126 = vmatprep.subr.bf16.mxu0 %v2893_v50  ;;  %2178 = vmatprep.mubr.bf16.mxu1 %v2819_v1 }
 0x23e   :  { %2127 = vmatpush3.bf16.msra.mxu0 %v2893_v50 }
 0x23f   :  { %2128 = vmatprep.subr.bf16.mxu0 %v2897_v61 }
 0x242   :  { %2129 = vmatpush3.bf16.msra.mxu0 %v2897_v61  ;;  %2179 = vmatmul.mubr.bf16.gmra.mxu1 %v2817_v0 }
 0x243   :  { %2130 = vmatprep.subr.bf16.mxu0 %v2901_v57  ;;  %2230 = vmatprep.mubr.bf16.mxu1 %v2830_v4 }
 0x246   :  { %2131 = vmatpush3.bf16.msra.mxu0 %v2901_v57 }
 0x247   :  { %2132 = vmatprep.subr.bf16.mxu0 %v2905_v55 }
 0x24a   :  { %2133 = vmatpush3.bf16.msra.mxu0 %v2905_v55 }
 0x24b   :  { %2182 = vmatprep.subr.bf16.mxu0 %v2397_v58 }
 0x24d   :  { %2135 = vmatmul.mubr.bf16.vlgmr.msra.gmra.mxu0 %v2851_v14 }
 0x24e   :  { %2138 = vmatprep.mubr.bf16.mxu0 %v2853_v15  ;;  %2183 = vmatpush3.bf16.msra.mxu0 %v2397_v58 }
 0x24f   :  { %2184 = vmatprep.subr.bf16.mxu0 %v2399_v56 }
 0x252   :  { %2185 = vmatpush3.bf16.msra.mxu0 %v2399_v56 }
 0x253   :  { %2186 = vmatprep.subr.bf16.mxu0 %v2401_v8 }
 0x255   :  { %2139 = vmatmul.mubr.bf16.gmra.mxu0 %v2858_v17 }
 0x256   :  { %2142 = vmatprep.mubr.bf16.mxu0 %v2860_v18  ;;  %2187 = vmatpush3.bf16.msra.mxu0 %v2401_v8 }
 0x257   :  { %2188 = vmatprep.subr.bf16.mxu0 %v2403_v10 }
 0x25a   :  { %2189 = vmatpush3.bf16.msra.mxu0 %v2403_v10 }
 0x25b   :  { %2190 = vmatprep.subr.bf16.mxu0 %v2405_v11 }
 0x25d   :  { %2143 = vmatmul.mubr.bf16.gmra.mxu0 %v2864_v19 }
 0x25e   :  { %2146 = vmatprep.mubr.bf16.mxu0 %v2866_v20  ;;  %2191 = vmatpush3.bf16.msra.mxu0 %v2405_v11 }
 0x25f   :  { %2192 = vmatprep.subr.bf16.mxu0 %v2407_v12 }
 0x262   :  { %2193 = vmatpush3.bf16.msra.mxu0 %v2407_v12 }
 0x263   :  { %2194 = vmatprep.subr.bf16.mxu0 %v2409_v16 }
 0x265   :  { %2147 = vmatmul.mubr.bf16.gmra.mxu0 %v2870_v21 }
 0x266   :  { %2195 = vmatpush3.bf16.msra.mxu0 %v2409_v16 }
 0x267   :  { %2196 = vmatprep.subr.bf16.mxu0 %v2410_v22 }
 0x26a   :  { %2197 = vmatpush3.bf16.msra.mxu0 %v2410_v22 }
 0x26b   :  { %2246 = vmatprep.subr.bf16.mxu0 %v2411_v23 }
 0x2ea   :  { %v2933_v52 = vpop.f32.mrf.mxu1 }
 0x2ec   :  { %v2935_v53 = vpop.f32.mrf.mxu1 }
 0x2ee   :  { %v2937_v54 = vpop.f32.mrf.mxu1 }
 0x2f0   :  { %v2939_v59 = vpop.f32.mrf.mxu1 }
 0x2f2   :  { %v2172_v62 = vpop.f32.mrf.mxu1 }
 0x30d   :  { %v2136_v9 = vpop.f32.mrf.mxu0 }
 0x30f   :  { %v611_v24 = vpop.f32.mrf.mxu0 }
 0x311   :  { %v2137_v25 = vpop.f32.mrf.mxu0 }
 0x312   :  { %v675_v27 = vpack.c.bf16 %v2137_v25, %v2136_v9 }
 0x313   :  { %v614_v6 = vpop.f32.mrf.mxu0 }
 0x314   :  { %v674_v26 = vpack.c.bf16 %v614_v6, %v611_v24 }
 0x315   :  { %v2140_v28 = vpop.f32.mrf.mxu0 }
 0x316   :  { %2198 = vmatprep.mubr.bf16.mxu0 %v674_v26 }
 0x317   :  { %v627_v5 = vpop.f32.mrf.mxu0  ;;  %2199 = vmatmul.mubr.bf16.vlgmr.msra.gmra.mxu0 %v675_v27  ;;  %v2952_v27 = vld [vmem:[%s3036_s6] ss:$0 sm:$0xff] }
 0x318   :  { %2247 = vmatpush3.bf16.msra.mxu0 %v2411_v23 }
 0x319   :  { %v2141_v3 = vpop.f32.mrf.mxu0  ;;  %2248 = vmatprep.subr.bf16.mxu0 %v2412_v29 }
 0x31a   :  { %v677_v0 = vpack.c.bf16 %v2141_v3, %v2140_v28 }
 0x31b   :  { %v630_v1 = vpop.f32.mrf.mxu0 }
 0x31c   :  { %v676_v30 = vpack.c.bf16 %v630_v1, %v627_v5  ;;  %2249 = vmatpush3.bf16.msra.mxu0 %v2412_v29 }
 0x31d   :  { %v2144_v4 = vpop.f32.mrf.mxu0  ;;  %2250 = vmatprep.subr.bf16.mxu0 %v2413_v2 }
 0x31e   :  { %2202 = vmatprep.mubr.bf16.mxu0 %v676_v30 }
 0x31f   :  { %v643_v33 = vpop.f32.mrf.mxu0  ;;  %2203 = vmatmul.mubr.bf16.gmra.mxu0 %v677_v0 }
 0x320   :  { %2251 = vmatpush3.bf16.msra.mxu0 %v2413_v2 }
 0x321   :  { %v2145_v34 = vpop.f32.mrf.mxu0  ;;  %2252 = vmatprep.subr.bf16.mxu0 %v2414_v31 }
 0x322   :  { %v679_v39 = vpack.c.bf16 %v2145_v34, %v2144_v4 }
 0x323   :  { %v646_v37 = vpop.f32.mrf.mxu0 }
 0x324   :  { %v678_v38 = vpack.c.bf16 %v646_v37, %v643_v33  ;;  %2253 = vmatpush3.bf16.msra.mxu0 %v2414_v31 }
 0x325   :  { %v2148_v41 = vpop.f32.mrf.mxu0  ;;  %2254 = vmatprep.subr.bf16.mxu0 %v2415_v35 }
 0x326   :  { %2206 = vmatprep.mubr.bf16.mxu0 %v678_v38 }
 0x327   :  { %v659_v43 = vpop.f32.mrf.mxu0  ;;  %2207 = vmatmul.mubr.bf16.gmra.mxu0 %v679_v39 }
 0x328   :  { %2255 = vmatpush3.bf16.msra.mxu0 %v2415_v35 }
 0x329   :  { %v2149_v44 = vpop.f32.mrf.mxu0  ;;  %2256 = vmatprep.subr.bf16.mxu0 %v2416_v42 }
 0x32a   :  { %v681_v49 = vpack.c.bf16 %v2149_v44, %v2148_v41 }
 0x32b   :  { %v662_v47 = vpop.f32.mrf.mxu0 }
 0x32c   :  { %v680_v48 = vpack.c.bf16 %v662_v47, %v659_v43  ;;  %2257 = vmatpush3.bf16.msra.mxu0 %v2416_v42 }
 0x32d   :  { %2258 = vmatprep.subr.bf16.mxu0 %v2417_v45 }
 0x32e   :  { %2210 = vmatprep.mubr.bf16.mxu0 %v680_v48 }
 0x32f   :  { %2211 = vmatmul.mubr.bf16.gmra.mxu0 %v681_v49 }
 0x330   :  { %2259 = vmatpush3.bf16.msra.mxu0 %v2417_v45  ;;  %2262 = vmatprep.mubr.bf16.mxu0 %v2905_v55 }
 0x331   :  { %2260 = vmatprep.subr.bf16.mxu0 %v2418_v51 }
 0x334   :  { %2261 = vmatpush3.bf16.msra.mxu0 %v2418_v51 }
 0x337   :  { %2263 = vmatmul.mubr.bf16.vlgmr.msra.gmra.mxu0 %v2901_v57 }
 0x338   :  { %2266 = vmatprep.mubr.bf16.mxu0 %v2897_v61  ;;  %v2941_v61 = vpop.f32.mrf.mxu1 }
 0x33f   :  { %2267 = vmatmul.mubr.bf16.gmra.mxu0 %v2893_v50  ;;  %v2173_v50 = vpop.f32.mrf.mxu1 }
 0x340   :  { %2270 = vmatprep.mubr.bf16.mxu0 %v2889_v46 }
 0x341   :  { %v815_v60 = vpop.f32.mrf.mxu1 }
 0x347   :  { %2271 = vmatmul.mubr.bf16.gmra.mxu0 %v2885_v40 }
 0x348   :  { %2274 = vmatprep.mubr.bf16.mxu0 %v2880_v36  ;;  %v2176_v36 = vpop.f32.mrf.mxu1 }
 0x34a   :  { %v828_v63 = vpop.f32.mrf.mxu1 }
 0x34c   :  { %v2177_v58 = vpop.f32.mrf.mxu1 }
 0x34e   :  { %v831_v10 = vpop.f32.mrf.mxu1 }
 0x34f   :  { %2275 = vmatmul.mubr.bf16.gmra.mxu0 %v2878_v32 }
 0x350   :  { %v2180_v12 = vpop.f32.mrf.mxu1 }
 0x352   :  { %v844_v22 = vpop.f32.mrf.mxu1 }
 0x354   :  { %v2181_v25 = vpop.f32.mrf.mxu1 }
 0x356   :  { %v847_v1 = vpop.f32.mrf.mxu1 }
 0x3d7   :  { %v2943_v46 = vpop.f32.mrf.mxu0 }
 0x3d9   :  { %v2945_v40 = vpop.f32.mrf.mxu0 }
 0x3db   :  { %v2201_v57 = vpop.f32.mrf.mxu0 }
 0x3dd   :  { %v2947_v32 = vpop.f32.mrf.mxu0 }
 0x3df   :  { %v2204_v7 = vpop.f32.mrf.mxu0 }
 0x3e0   :  { %v966_v51 = vadd.f32 %v2204_v7, %v2172_v62 }
 0x3e1   :  { %v957_v55 = vpop.f32.mrf.mxu0 }
 0x3e3   :  { %v2205_v56 = vpop.f32.mrf.mxu0 }
 0x3e4   :  { %v969_v45 = vadd.f32 %v2205_v56, %v2173_v50  ;;  %v958_v50 = vadd.f32 %v957_v55, %v2941_v61  ;;  %v945_v61 = vadd.f32 %v2947_v32, %v2939_v59 }
 0x3e5   :  { %v960_v8 = vpop.f32.mrf.mxu0 }
 0x3e7   :  { %v2208_v11 = vpop.f32.mrf.mxu0 }
 0x3e8   :  { %v982_v2 = vadd.f32 %v2208_v11, %v2176_v36  ;;  %v961_v11 = vadd.f32 %v960_v8, %v815_v60  ;;  %v1015_v8 = vadd.f32 %v2952_v27, %v958_v50  ;;  %v2434_v50 = vld [vmem:[#allocation14] sm:$0xff]  }
 0x3e9   :  { %v973_v13 = vpop.f32.mrf.mxu0 }
 0x3ea   :  { %v1021_v39 = vadd.f32 %v2952_v27, %v982_v2  ;;  %v974_v41 = vadd.f32 %v973_v13, %v828_v63  ;;  %v1017_v13 = vadd.f32 %v2952_v27, %v966_v51  ;;  %v1016_v62 = vadd.f32 %v2952_v27, %v961_v11  ;;  %v2423_v2 = vld [vmem:[#allocation11 + $0x18] sm:$0xff]  }
 0x3eb   :  { %v2209_v16 = vpop.f32.mrf.mxu0 }
 0x3ec   :  { %v985_v28 = vadd.f32 %v2209_v16, %v2177_v58  ;;  %v1037_v36 = vmax.f32 %v1021_v39, 0.0  ;;  %v1019_v58 = vadd.f32 %v2952_v27, %v974_v41  ;;  %v953_v16 = vadd.f32 %v2201_v57, %v2937_v54 }
 0x3ed   :  { %v976_v23 = vpop.f32.mrf.mxu0  ;;  %v1033_v60 = vmax.f32 %v1017_v13, 0.0  ;;  %v1032_v55 = vmax.f32 %v1016_v62, 0.0  ;;  %v942_v57 = vadd.f32 %v2945_v40, %v2935_v53  ;;  %v2419_v53 = vld [vmem:[#allocation11 + $0x38] sm:$0xff]   ;;  %v2420_v40 = vld [vmem:[#allocation11 + $0x30] sm:$0xff]   ;;  %v2433_v13 = vld [vmem:[#allocation14 + $0x8] sm:$0xff]  }
 0x3ee   :  { %v1022_v33 = vadd.f32 %v2952_v27, %v985_v28  ;;  %v977_v34 = vadd.f32 %v976_v23, %v831_v10  ;;  %v1018_v10 = vadd.f32 %v2952_v27, %v969_v45  ;;  %v1035_v56 = vmax.f32 %v1019_v58, 0.0 }
 0x3ef   :  { %v2212_v9 = vpop.f32.mrf.mxu0  ;;  %v950_v23 = vadd.f32 %v2943_v46, %v2933_v52  ;;  %v1012_v46 = vadd.f32 %v2952_v27, %v945_v61  ;;  %v1011_v28 = vadd.f32 %v2952_v27, %v942_v57 }
 0x3f0   :  { %v998_v24 = vadd.f32 %v2212_v9, %v2180_v12  ;;  %v1038_v47 = vmax.f32 %v1022_v33, 0.0  ;;  %v1020_v48 = vadd.f32 %v2952_v27, %v977_v34  ;;  %v1014_v9 = vadd.f32 %v2952_v27, %v953_v16 }
 0x3f1   :  { %v989_v6 = vpop.f32.mrf.mxu0  ;;  %v1013_v54 = vadd.f32 %v2952_v27, %v950_v23  ;;  %v1028_v59 = vmax.f32 %v1012_v46, 0.0 }
 0x3f2   :  { %v990_v26 = vadd.f32 %v989_v6, %v844_v22  ;;  %v1025_v5 = vadd.f32 %v2952_v27, %v998_v24  ;;  %v1036_v12 = vmax.f32 %v1020_v48, 0.0  ;;  %v1048_v63 = vpack.c.bf16 %v1038_v47, %v1037_v36 }
 0x3f3   :  { %v2213_v29 = vpop.f32.mrf.mxu0  ;;  %v1034_v22 = vmax.f32 %v1018_v10, 0.0  ;;  %v1030_v52 = vmax.f32 %v1014_v9, 0.0 }
 0x3f4   :  { %v1001_v3 = vadd.f32 %v2213_v29, %v2181_v25  ;;  %v1023_v0 = vadd.f32 %v2952_v27, %v990_v26  ;;  %v1041_v35 = vmax.f32 %v1025_v5, 0.0  ;;  %v1047_v7 = vpack.c.bf16 %v1036_v12, %v1035_v56  ;;  %v2431_v12 = vld [vmem:[#allocation14 + $0x18] sm:$0xff]  }
 0x3f5   :  { %v992_v30 = vpop.f32.mrf.mxu0  ;;  %v1046_v24 = vpack.c.bf16 %v1034_v22, %v1033_v60  ;;  %v1031_v25 = vmax.f32 %v1015_v8, 0.0  ;;  %v1029_v26 = vmax.f32 %v1013_v54, 0.0  ;;  %v1027_v29 = vmax.f32 %v1011_v28, 0.0 }
 0x3f6   :  { %v1026_v4 = vadd.f32 %v2952_v27, %v1001_v3  ;;  %v993_v31 = vadd.f32 %v992_v30, %v847_v1  ;;  %v1039_v42 = vmax.f32 %v1023_v0, 0.0  ;;  %v2422_v3 = vld [vmem:[#allocation11 + $0x20] sm:$0xff]   ;;  %v2424_v1 = vld [vmem:[#allocation11 + $0x10] sm:$0xff]  }
 0x3f7   :  { %v1045_v6 = vpack.c.bf16 %v1032_v55, %v1031_v25  ;;  %v1044_v32 = vpack.c.bf16 %v1030_v52, %v1029_v26  ;;  %v1043_v5 = vpack.c.bf16 %v1028_v59, %v1027_v29  ;;  %v2264_v56 = vpop.f32.mrf.mxu0  ;;  %v2988_v25 = vld [vmem:[%s3039_s9] ss:$0 sm:$0xff] }
 0x3f8   :  { %v1042_v37 = vmax.f32 %v1026_v4, 0.0  ;;  %v1024_v38 = vadd.f32 %v2952_v27, %v993_v31  ;;  %v2421_v27 = vld [vmem:[#allocation11 + $0x28] sm:$0xff]  }
 0x3f9   :  { %v1270_v16 = vpop.f32.mrf.mxu0 }
 0x3fa   :  { %v1040_v43 = vmax.f32 %v1024_v38, 0.0  ;;  %v1050_v44 = vpack.c.bf16 %v1042_v37, %v1041_v35 }
 0x3fb   :  { %v2265_v22 = vpop.f32.mrf.mxu0 }
 0x3fc   :  { %2214 = vmatprep.subr.bf16.mxu1 %v1050_v44  ;;  %v1049_v49 = vpack.c.bf16 %v1040_v43, %v1039_v42 }
 0x3fd   :  { %2215 = vmatpush3.bf16.msra.mxu1 %v1050_v44  ;;  %v1273_v62 = vpop.f32.mrf.mxu0 }
 0x3fe   :  { %2216 = vmatprep.subr.bf16.mxu1 %v1049_v49 }
 0x401   :  { %2217 = vmatpush3.bf16.msra.mxu1 %v1049_v49 }
 0x402   :  { %2218 = vmatprep.subr.bf16.mxu1 %v1048_v63 }
 0x405   :  { %2219 = vmatpush3.bf16.msra.mxu1 %v1048_v63  ;;  %v2432_v63 = vld [vmem:[#allocation14 + $0x10] sm:$0xff]  }
 0x406   :  { %2220 = vmatprep.subr.bf16.mxu1 %v1047_v7 }
 0x409   :  { %2221 = vmatpush3.bf16.msra.mxu1 %v1047_v7  ;;  %v2268_v7 = vpop.f32.mrf.mxu0 }
 0x40a   :  { %2222 = vmatprep.subr.bf16.mxu1 %v1046_v24 }
 0x40b   :  { %v1286_v23 = vpop.f32.mrf.mxu0 }
 0x40d   :  { %2223 = vmatpush3.bf16.msra.mxu1 %v1046_v24  ;;  %v2269_v60 = vpop.f32.mrf.mxu0 }
 0x40e   :  { %2224 = vmatprep.subr.bf16.mxu1 %v1045_v6 }
 0x40f   :  { %v1289_v8 = vpop.f32.mrf.mxu0 }
 0x411   :  { %2225 = vmatpush3.bf16.msra.mxu1 %v1045_v6  ;;  %v2272_v61 = vpop.f32.mrf.mxu0 }
 0x412   :  { %2226 = vmatprep.subr.bf16.mxu1 %v1044_v32 }
 0x413   :  { %v1302_v46 = vpop.f32.mrf.mxu0 }
 0x415   :  { %2227 = vmatpush3.bf16.msra.mxu1 %v1044_v32 }
 0x416   :  { %2228 = vmatprep.subr.bf16.mxu1 %v1043_v5 }
 0x419   :  { %2229 = vmatpush3.bf16.msra.mxu1 %v1043_v5 }
 0x41a   :  { %2278 = vmatprep.subr.bf16.mxu1 %v2419_v53 }
 0x41c   :  { %2231 = vmatmul.mubr.bf16.vlgmr.msra.gmra.mxu1 %v2851_v14  ;;  %v2425_v14 = vld [vmem:[#allocation11 + $0x8] sm:$0xff]  }
 0x41d   :  { %2234 = vmatprep.mubr.bf16.mxu1 %v2853_v15  ;;  %2279 = vmatpush3.bf16.msra.mxu1 %v2419_v53  ;;  %v2426_v15 = vld [vmem:[#allocation11] sm:$0xff]   ;;  %v2273_v53 = vpop.f32.mrf.mxu0 }
 0x41e   :  { %2280 = vmatprep.subr.bf16.mxu1 %v2420_v40 }
 0x421   :  { %2281 = vmatpush3.bf16.msra.mxu1 %v2420_v40 }
 0x422   :  { %2282 = vmatprep.subr.bf16.mxu1 %v2421_v27 }
 0x424   :  { %2235 = vmatmul.mubr.bf16.gmra.mxu1 %v2858_v17  ;;  %v2427_v17 = vld [vmem:[#allocation14 + $0x38] sm:$0xff]  }
 0x425   :  { %2238 = vmatprep.mubr.bf16.mxu1 %v2860_v18  ;;  %2283 = vmatpush3.bf16.msra.mxu1 %v2421_v27  ;;  %v2428_v18 = vld [vmem:[#allocation14 + $0x30] sm:$0xff]  }
 0x426   :  { %2284 = vmatprep.subr.bf16.mxu1 %v2422_v3  ;;  %2310 = vmatprep.subr.bf16.mxu0 %v2427_v17 }
 0x427   :  { %2311 = vmatpush3.bf16.msra.mxu0 %v2427_v17 }
 0x428   :  { %2312 = vmatprep.subr.bf16.mxu0 %v2428_v18 }
 0x429   :  { %2285 = vmatpush3.bf16.msra.mxu1 %v2422_v3 }
 0x42a   :  { %2286 = vmatprep.subr.bf16.mxu1 %v2423_v2 }
 0x42b   :  { %2313 = vmatpush3.bf16.msra.mxu0 %v2428_v18 }
 0x42c   :  { %2239 = vmatmul.mubr.bf16.gmra.mxu1 %v2864_v19  ;;  %v2429_v19 = vld [vmem:[#allocation14 + $0x28] sm:$0xff]  }
 0x42d   :  { %2242 = vmatprep.mubr.bf16.mxu1 %v2866_v20  ;;  %2287 = vmatpush3.bf16.msra.mxu1 %v2423_v2  ;;  %v2430_v20 = vld [vmem:[#allocation14 + $0x20] sm:$0xff]  }
 0x42e   :  { %2288 = vmatprep.subr.bf16.mxu1 %v2424_v1  ;;  %2314 = vmatprep.subr.bf16.mxu0 %v2429_v19 }
 0x42f   :  { %2315 = vmatpush3.bf16.msra.mxu0 %v2429_v19 }
 0x430   :  { %2316 = vmatprep.subr.bf16.mxu0 %v2430_v20 }
 0x431   :  { %2289 = vmatpush3.bf16.msra.mxu1 %v2424_v1 }
 0x432   :  { %2290 = vmatprep.subr.bf16.mxu1 %v2425_v14 }
 0x433   :  { %2317 = vmatpush3.bf16.msra.mxu0 %v2430_v20 }
 0x434   :  { %2243 = vmatmul.mubr.bf16.gmra.mxu1 %v2870_v21  ;;  %2318 = vmatprep.subr.bf16.mxu0 %v2431_v12 }
 0x435   :  { %2291 = vmatpush3.bf16.msra.mxu1 %v2425_v14 }
 0x436   :  { %2292 = vmatprep.subr.bf16.mxu1 %v2426_v15 }
 0x437   :  { %2319 = vmatpush3.bf16.msra.mxu0 %v2431_v12 }
 0x438   :  { %2320 = vmatprep.subr.bf16.mxu0 %v2432_v63 }
 0x439   :  { %2293 = vmatpush3.bf16.msra.mxu1 %v2426_v15 }
 0x43a   :  { %2342 = vmatprep.subr.bf16.mxu1 %v2427_v17 }
 0x43b   :  { %2321 = vmatpush3.bf16.msra.mxu0 %v2432_v63 }
 0x43c   :  { %2322 = vmatprep.subr.bf16.mxu0 %v2433_v13 }
 0x43f   :  { %2323 = vmatpush3.bf16.msra.mxu0 %v2433_v13 }
 0x440   :  { %2324 = vmatprep.subr.bf16.mxu0 %v2434_v50 }
 0x443   :  { %2325 = vmatpush3.bf16.msra.mxu0 %v2434_v50 }
 0x4dc   :  { %v2232_v21 = vpop.f32.mrf.mxu1 }
 0x4de   :  { %v1085_v30 = vpop.f32.mrf.mxu1 }
 0x4e0   :  { %v2233_v0 = vpop.f32.mrf.mxu1 }
 0x4e1   :  { %v1149_v33 = vpack.c.bf16 %v2233_v0, %v2232_v21 }
 0x4e2   :  { %v1088_v4 = vpop.f32.mrf.mxu1 }
 0x4e3   :  { %v1148_v31 = vpack.c.bf16 %v1088_v4, %v1085_v30 }
 0x4e4   :  { %v2236_v34 = vpop.f32.mrf.mxu1 }
 0x4e5   :  { %2294 = vmatprep.mubr.bf16.mxu1 %v1148_v31 }
 0x4e6   :  { %v1101_v35 = vpop.f32.mrf.mxu1  ;;  %2295 = vmatmul.mubr.bf16.vlgmr.msra.gmra.mxu1 %v1149_v33 }
 0x4e7   :  { %2350 = vmatpush3.bf16.msra.mxu1 %v2427_v17 }
 0x4e8   :  { %v2237_v37 = vpop.f32.mrf.mxu1  ;;  %2343 = vmatprep.subr.bf16.mxu1 %v2428_v18 }
 0x4e9   :  { %v1151_v41 = vpack.c.bf16 %v2237_v37, %v2236_v34 }
 0x4ea   :  { %v1104_v38 = vpop.f32.mrf.mxu1 }
 0x4eb   :  { %v1150_v39 = vpack.c.bf16 %v1104_v38, %v1101_v35  ;;  %2351 = vmatpush3.bf16.msra.mxu1 %v2428_v18 }
 0x4ec   :  { %v2240_v42 = vpop.f32.mrf.mxu1  ;;  %2344 = vmatprep.subr.bf16.mxu1 %v2429_v19 }
 0x4ed   :  { %2298 = vmatprep.mubr.bf16.mxu1 %v1150_v39 }
 0x4ee   :  { %v1117_v43 = vpop.f32.mrf.mxu1  ;;  %2299 = vmatmul.mubr.bf16.gmra.mxu1 %v1151_v41 }
 0x4ef   :  { %2352 = vmatpush3.bf16.msra.mxu1 %v2429_v19 }
 0x4f0   :  { %v2241_v44 = vpop.f32.mrf.mxu1  ;;  %2345 = vmatprep.subr.bf16.mxu1 %v2430_v20 }
 0x4f1   :  { %v1153_v48 = vpack.c.bf16 %v2241_v44, %v2240_v42 }
 0x4f2   :  { %v1120_v45 = vpop.f32.mrf.mxu1 }
 0x4f3   :  { %v1152_v47 = vpack.c.bf16 %v1120_v45, %v1117_v43  ;;  %2353 = vmatpush3.bf16.msra.mxu1 %v2430_v20  ;;  %v1305_v20 = vpop.f32.mrf.mxu0 }
 0x4f4   :  { %v2244_v49 = vpop.f32.mrf.mxu1  ;;  %2346 = vmatprep.subr.bf16.mxu1 %v2431_v12 }
 0x4f5   :  { %2302 = vmatprep.mubr.bf16.mxu1 %v1152_v47  ;;  %v2276_v37 = vpop.f32.mrf.mxu0 }
 0x4f6   :  { %v1133_v51 = vpop.f32.mrf.mxu1  ;;  %2303 = vmatmul.mubr.bf16.gmra.mxu1 %v1153_v48 }
 0x4f7   :  { %2354 = vmatpush3.bf16.msra.mxu1 %v2431_v12 }
 0x4f8   :  { %v2245_v36 = vpop.f32.mrf.mxu1  ;;  %2347 = vmatprep.subr.bf16.mxu1 %v2432_v63 }
 0x4f9   :  { %v1155_v11 = vpack.c.bf16 %v2245_v36, %v2244_v49 }
 0x4fa   :  { %v1136_v58 = vpop.f32.mrf.mxu1 }
 0x4fb   :  { %v1154_v10 = vpack.c.bf16 %v1136_v58, %v1133_v51  ;;  %2355 = vmatpush3.bf16.msra.mxu1 %v2432_v63  ;;  %v1318_v51 = vpop.f32.mrf.mxu0 }
 0x4fc   :  { %2348 = vmatprep.subr.bf16.mxu1 %v2433_v13 }
 0x4fd   :  { %2306 = vmatprep.mubr.bf16.mxu1 %v1154_v10 }
 0x4fe   :  { %2307 = vmatmul.mubr.bf16.gmra.mxu1 %v1155_v11 }
 0x4ff   :  { %2356 = vmatpush3.bf16.msra.mxu1 %v2433_v13 }
 0x500   :  { %2349 = vmatprep.subr.bf16.mxu1 %v2434_v50 }
 0x503   :  { %2357 = vmatpush3.bf16.msra.mxu1 %v2434_v50 }
 0x5a6   :  { %v2296_v9 = vpop.f32.mrf.mxu1 }
 0x5a7   :  { %v1424_v54 = vadd.f32 %v2296_v9, %v2264_v56  ;;  %v2277_v56 = vpop.f32.mrf.mxu0 }
 0x5a8   :  { %v1415_v55 = vpop.f32.mrf.mxu1 }
 0x5a9   :  { %v1416_v24 = vadd.f32 %v1415_v55, %v1270_v16  ;;  %v1487_v32 = vadd.f32 %v2988_v25, %v1424_v54 }
 0x5aa   :  { %v2297_v57 = vpop.f32.mrf.mxu1 }
 0x5ab   :  { %v1427_v52 = vadd.f32 %v2297_v57, %v2265_v22  ;;  %v1485_v26 = vadd.f32 %v2988_v25, %v1416_v24  ;;  %v1503_v14 = vmax.f32 %v1487_v32, 0.0  ;;  %v1321_v24 = vpop.f32.mrf.mxu0 }
 0x5ac   :  { %v1418_v6 = vpop.f32.mrf.mxu1 }
 0x5ad   :  { %v1488_v28 = vadd.f32 %v2988_v25, %v1427_v52  ;;  %v1419_v59 = vadd.f32 %v1418_v6, %v1273_v62  ;;  %v1501_v3 = vmax.f32 %v1485_v26, 0.0 }
 0x5ae   :  { %v2300_v29 = vpop.f32.mrf.mxu1 }
 0x5af   :  { %v1486_v5 = vadd.f32 %v2988_v25, %v1419_v59  ;;  %v1504_v40 = vmax.f32 %v1488_v28, 0.0  ;;  %v1440_v15 = vadd.f32 %v2300_v29, %v2268_v7 }
 0x5b0   :  { %v1431_v27 = vpop.f32.mrf.mxu1 }
 0x5b1   :  { %v1502_v2 = vmax.f32 %v1486_v5, 0.0  ;;  %v1432_v1 = vadd.f32 %v1431_v27, %v1286_v23  ;;  %v1518_v21 = vpack.c.bf16 %v1504_v40, %v1503_v14  ;;  %v1491_v33 = vadd.f32 %v2988_v25, %v1440_v15  ;;  %v3009_v27 = vld [vmem:[%s3041_s11] ss:$0 sm:$0xff]  ;;  %s2701_s11 = smov [#allocation16]  }
 0x5b2   :  { %v2301_v17 = vpop.f32.mrf.mxu1  ;;  %s1810_s22 = sshll.u32 %s2701_s11, 4  ;;  %s1811_s22 = int_to_ptr.vmem [resolvable:$true] %s1810_s22 }
 0x5b3   :  { %v1443_v18 = vadd.f32 %v2301_v17, %v2269_v60  ;;  %v1517_v19 = vpack.c.bf16 %v1502_v2, %v1501_v3  ;;  %v1489_v0 = vadd.f32 %v2988_v25, %v1432_v1  ;;  %v1507_v44 = vmax.f32 %v1491_v33, 0.0  ;;  %s2659_s23 = scalar_lea.vmem %s1811_s22, 2048  ;;  %p2664_p13 = scmp.lt.s32.totalorder %s1811_s22, %s1811_s22 }
 0x5b4   :  { %v1434_v30 = vpop.f32.mrf.mxu1  ;;  %p2660_p12 = scmp.ne.s32.totalorder %s1811_s22, %s2659_s23  ;;  %p2665_p0 = scmp.lt.s32.totalorder %s2659_s23, %s2659_s23 }
 0x5b5   :  { %v1492_v4 = vadd.f32 %v2988_v25, %v1443_v18  ;;  %v1435_v31 = vadd.f32 %v1434_v30, %v1289_v8  ;;  %2326 = vmatprep.mubr.bf16.mxu0 %v1517_v19  ;;  %v1505_v41 = vmax.f32 %v1489_v0, 0.0 }
 0x5b6   :  { %v2304_v34 = vpop.f32.mrf.mxu1  ;;  %2327 = vmatmul.mubr.bf16.vlgmr.msra.gmra.mxu0 %v1518_v21  ;;  %p2666_p1 = por %p2665_p0, %p2664_p13 }
 0x5b7   :  { %v1490_v35 = vadd.f32 %v2988_v25, %v1435_v31  ;;  %v1508_v38 = vmax.f32 %v1492_v4, 0.0  ;;  %v1456_v45 = vadd.f32 %v2304_v34, %v2272_v61 }
 0x5b8   :  { %v1447_v39 = vpop.f32.mrf.mxu1  ;;  %p2667_p2 = pnand %p2666_p1, %p2660_p12 }
 0x5b9   :  { %v1506_v42 = vmax.f32 %v1490_v35, 0.0  ;;  %v1448_v43 = vadd.f32 %v1447_v39, %v1302_v46  ;;  %v1520_v58 = vpack.c.bf16 %v1508_v38, %v1507_v44  ;;  %v1495_v63 = vadd.f32 %v2988_v25, %v1456_v45 }
 0x5ba   :  { %v2305_v47 = vpop.f32.mrf.mxu1 }
 0x5bb   :  { %v1459_v48 = vadd.f32 %v2305_v47, %v2273_v53  ;;  %v1519_v49 = vpack.c.bf16 %v1506_v42, %v1505_v41  ;;  %v1493_v10 = vadd.f32 %v2988_v25, %v1448_v43  ;;  %v1511_v60 = vmax.f32 %v1495_v63, 0.0 }
 0x5bc   :  { %v1450_v36 = vpop.f32.mrf.mxu1 }
 0x5bd   :  { %v1496_v11 = vadd.f32 %v2988_v25, %v1459_v48  ;;  %v1451_v12 = vadd.f32 %v1450_v36, %v1305_v20  ;;  %2330 = vmatprep.mubr.bf16.mxu0 %v1519_v49  ;;  %v1509_v62 = vmax.f32 %v1493_v10, 0.0 }
 0x5be   :  { %v2308_v13 = vpop.f32.mrf.mxu1  ;;  %2331 = vmatmul.mubr.bf16.gmra.mxu0 %v1520_v58 }
 0x5bf   :  { %v1494_v50 = vadd.f32 %v2988_v25, %v1451_v12  ;;  %v1512_v16 = vmax.f32 %v1496_v11, 0.0  ;;  %v1472_v8 = vadd.f32 %v2308_v13, %v2276_v37 }
 0x5c0   :  { %v1463_v22 = vpop.f32.mrf.mxu1 }
 0x5c1   :  { %v1510_v7 = vmax.f32 %v1494_v50, 0.0  ;;  %v1464_v23 = vadd.f32 %v1463_v22, %v1318_v51  ;;  %v1522_v54 = vpack.c.bf16 %v1512_v16, %v1511_v60  ;;  %v1499_v26 = vadd.f32 %v2988_v25, %v1472_v8 }
 0x5c2   :  { %v2309_v9 = vpop.f32.mrf.mxu1 }
 0x5c3   :  { %v1475_v61 = vadd.f32 %v2309_v9, %v2277_v56  ;;  %v1521_v55 = vpack.c.bf16 %v1510_v7, %v1509_v62  ;;  %v1497_v52 = vadd.f32 %v2988_v25, %v1464_v23  ;;  %v1515_v5 = vmax.f32 %v1499_v26, 0.0 }
 0x5c4   :  { %v1466_v57 = vpop.f32.mrf.mxu1 }
 0x5c5   :  { %v1500_v46 = vadd.f32 %v2988_v25, %v1475_v61  ;;  %v1467_v6 = vadd.f32 %v1466_v57, %v1321_v24  ;;  %2334 = vmatprep.mubr.bf16.mxu1 %v1521_v55  ;;  %v1513_v32 = vmax.f32 %v1497_v52, 0.0 }
 0x5c6   :  { %2335 = vmatmul.mubr.bf16.vlgmr.msra.gmra.mxu1 %v1522_v54 }
 0x5c7   :  { %v1498_v28 = vadd.f32 %v2988_v25, %v1467_v6  ;;  %v1516_v59 = vmax.f32 %v1500_v46, 0.0 }
 0x5c9   :  { %v1514_v29 = vmax.f32 %v1498_v28, 0.0  ;;  %v1524_v40 = vpack.c.bf16 %v1516_v59, %v1515_v5 }
 0x5cb   :  { %v1523_v53 = vpack.c.bf16 %v1514_v29, %v1513_v32 }
 0x5cd   :  { %2338 = vmatprep.mubr.bf16.mxu1 %v1523_v53 }
 0x5ce   :  { %2339 = vmatmul.mubr.bf16.gmra.mxu1 %v1524_v40 }
 0x676   :  { %v2328_v3 = vpop.f32.mrf.mxu0 }
 0x677   :  { %v1639_v2 = vadd.f32 %v2328_v3, %v3009_v27 }
 0x678   :  { %v1630_v1 = vpop.f32.mrf.mxu0 }
 0x679   :  { %v1896_v14 = vmul.f32 -1.442695, %v1639_v2  ;;  %v1631_v25 = vadd.f32 %v3009_v27, %v1630_v1 }
 0x67a   :  { %v2329_v15 = vpop.f32.mrf.mxu0 }
 0x67b   :  { %2435 = vpow2.f32 %v1896_v14  ;;  %v1894_v17 = vmul.f32 -1.442695, %v1631_v25  ;;  %v1642_v18 = vadd.f32 %v2329_v15, %v3009_v27 }
 0x67c   :  { %v1633_v19 = vpop.f32.mrf.mxu0 }
 0x67d   :  { %2437 = vpow2.f32 %v1894_v17  ;;  %v1897_v20 = vmul.f32 -1.442695, %v1642_v18  ;;  %v1634_v21 = vadd.f32 %v3009_v27, %v1633_v19 }
 0x67e   :  { %v2332_v30 = vpop.f32.mrf.mxu0 }
 0x67f   :  { %2439 = vpow2.f32 %v1897_v20  ;;  %v1895_v0 = vmul.f32 -1.442695, %v1634_v21  ;;  %v1655_v4 = vadd.f32 %v2332_v30, %v3009_v27 }
 0x680   :  { %v1646_v31 = vpop.f32.mrf.mxu0 }
 0x681   :  { %2441 = vpow2.f32 %v1895_v0  ;;  %v1900_v33 = vmul.f32 -1.442695, %v1655_v4  ;;  %v1647_v34 = vadd.f32 %v3009_v27, %v1646_v31 }
 0x682   :  { %v2333_v35 = vpop.f32.mrf.mxu0 }
 0x683   :  { %2443 = vpow2.f32 %v1900_v33  ;;  %v1898_v37 = vmul.f32 -1.442695, %v1647_v34  ;;  %v1658_v38 = vadd.f32 %v2333_v35, %v3009_v27 }
 0x684   :  { %v1649_v39 = vpop.f32.mrf.mxu0 }
 0x685   :  { %2445 = vpow2.f32 %v1898_v37  ;;  %v1901_v41 = vmul.f32 -1.442695, %v1658_v38  ;;  %v1650_v42 = vadd.f32 %v3009_v27, %v1649_v39 }
 0x686   :  { %v2336_v43 = vpop.f32.mrf.mxu1 }
 0x687   :  { %2447 = vpow2.f32 %v1901_v41  ;;  %v1899_v44 = vmul.f32 -1.442695, %v1650_v42  ;;  %v1671_v45 = vadd.f32 %v2336_v43, %v3009_v27 }
 0x688   :  { %v2436_v47 = vpop.eup %2435  ;;  %v1662_v48 = vpop.f32.mrf.mxu1 }
 0x689   :  { %v1743_v49 = vadd.f32 1.0, %v2436_v47  ;;  %2449 = vpow2.f32 %v1899_v44  ;;  %v1904_v51 = vmul.f32 -1.442695, %v1671_v45  ;;  %v1663_v36 = vadd.f32 %v3009_v27, %v1662_v48 }
 0x68a   :  { %v2438_v58 = vpop.eup %2437  ;;  %v2337_v10 = vpop.f32.mrf.mxu1 }
 0x68b   :  { %2451 = vrcp.f32 %v1743_v49  ;;  %v1741_v11 = vadd.f32 1.0, %v2438_v58  ;;  %v1902_v12 = vmul.f32 -1.442695, %v1663_v36  ;;  %v1674_v63 = vadd.f32 %v2337_v10, %v3009_v27 }
 0x68c   :  { %v2440_v13 = vpop.eup %2439  ;;  %2453 = vpow2.f32 %v1904_v51  ;;  %v1665_v50 = vpop.f32.mrf.mxu1 }
 0x68d   :  { %2455 = vrcp.f32 %v1741_v11  ;;  %v1744_v56 = vadd.f32 1.0, %v2440_v13  ;;  %v1905_v16 = vmul.f32 -1.442695, %v1674_v63  ;;  %v1666_v22 = vadd.f32 %v3009_v27, %v1665_v50 }
 0x68e   :  { %v2442_v62 = vpop.eup %2441  ;;  %2457 = vpow2.f32 %v1902_v12  ;;  %v2340_v7 = vpop.f32.mrf.mxu1 }
 0x68f   :  { %2459 = vrcp.f32 %v1744_v56  ;;  %v1742_v23 = vadd.f32 1.0, %v2442_v62  ;;  %v1903_v60 = vmul.f32 -1.442695, %v1666_v22  ;;  %v1687_v8 = vadd.f32 %v2340_v7, %v3009_v27 }
 0x690   :  { %v2444_v9 = vpop.eup %2443  ;;  %2461 = vpow2.f32 %v1905_v16  ;;  %v1678_v61 = vpop.f32.mrf.mxu1 }
 0x691   :  { %2463 = vrcp.f32 %v1742_v23  ;;  %v1747_v55 = vadd.f32 1.0, %v2444_v9  ;;  %v1908_v24 = vmul.f32 -1.442695, %v1687_v8  ;;  %v1679_v54 = vadd.f32 %v3009_v27, %v1678_v61 }
 0x692   :  { %v2446_v57 = vpop.eup %2445  ;;  %2465 = vpow2.f32 %v1903_v60  ;;  %v2341_v52 = vpop.f32.mrf.mxu1 }
 0x693   :  { %2467 = vrcp.f32 %v1747_v55  ;;  %v1745_v46 = vadd.f32 1.0, %v2446_v57  ;;  %v1906_v6 = vmul.f32 -1.442695, %v1679_v54  ;;  %v1690_v26 = vadd.f32 %v2341_v52, %v3009_v27 }
 0x694   :  { %v2448_v28 = vpop.eup %2447  ;;  %2469 = vpow2.f32 %v1908_v24  ;;  %v1681_v59 = vpop.f32.mrf.mxu1 }
 0x695   :  { %2471 = vrcp.f32 %v1745_v46  ;;  %v1748_v32 = vadd.f32 1.0, %v2448_v28  ;;  %v1909_v29 = vmul.f32 -1.442695, %v1690_v26  ;;  %v1682_v5 = vadd.f32 %v3009_v27, %v1681_v59 }
 0x696   :  { %v2450_v53 = vpop.eup %2449  ;;  %2473 = vpow2.f32 %v1906_v6 }
 0x697   :  { %2475 = vrcp.f32 %v1748_v32  ;;  %v1746_v40 = vadd.f32 1.0, %v2450_v53  ;;  %v1907_v3 = vmul.f32 -1.442695, %v1682_v5 }
 0x698   :  { %v2452_v2 = vpop.eup %2451  ;;  %2477 = vpow2.f32 %v1909_v29 }
 0x699   :  { %v2454_v1 = vpop.eup %2453  ;;  %1791 = vst [vmem:[#allocation16 + $0x10] sm:$0xff] %v2452_v2  ;;  %2479 = vrcp.f32 %v1746_v40 }
 0x69a   :  { %v2456_v14 = vpop.eup %2455  ;;  %v1751_v25 = vadd.f32 1.0, %v2454_v1  ;;  %2481 = vpow2.f32 %v1907_v3 }
 0x69b   :  { %v2458_v15 = vpop.eup %2457  ;;  %1789 = vst [vmem:[#allocation16] sm:$0xff] %v2456_v14 }
 0x69c   :  { %v2460_v17 = vpop.eup %2459  ;;  %2483 = vrcp.f32 %v1751_v25  ;;  %v1749_v18 = vadd.f32 1.0, %v2458_v15 }
 0x69d   :  { %v2462_v19 = vpop.eup %2461  ;;  %1792 = vst [vmem:[#allocation16 + $0x18] sm:$0xff] %v2460_v17 }
 0x69e   :  { %v2464_v27 = vpop.eup %2463  ;;  %2485 = vrcp.f32 %v1749_v18  ;;  %v1752_v20 = vadd.f32 1.0, %v2462_v19 }
 0x69f   :  { %v2466_v21 = vpop.eup %2465  ;;  %1790 = vst [vmem:[#allocation16 + $0x8] sm:$0xff] %v2464_v27 }
 0x6a0   :  { %v2468_v30 = vpop.eup %2467  ;;  %2487 = vrcp.f32 %v1752_v20  ;;  %v1750_v0 = vadd.f32 1.0, %v2466_v21 }
 0x6a1   :  { %v2470_v4 = vpop.eup %2469  ;;  %1795 = vst [vmem:[#allocation16 + $0x30] sm:$0xff] %v2468_v30 }
 0x6a2   :  { %v2472_v31 = vpop.eup %2471  ;;  %2489 = vrcp.f32 %v1750_v0  ;;  %v1755_v33 = vadd.f32 1.0, %v2470_v4 }
 0x6a3   :  { %v2474_v34 = vpop.eup %2473  ;;  %1793 = vst [vmem:[#allocation16 + $0x20] sm:$0xff] %v2472_v31 }
 0x6a4   :  { %v2476_v35 = vpop.eup %2475  ;;  %2491 = vrcp.f32 %v1755_v33  ;;  %v1753_v37 = vadd.f32 1.0, %v2474_v34 }
 0x6a5   :  { %v2478_v38 = vpop.eup %2477  ;;  %1796 = vst [vmem:[#allocation16 + $0x38] sm:$0xff] %v2476_v35 }
 0x6a6   :  { %v2480_v39 = vpop.eup %2479  ;;  %2493 = vrcp.f32 %v1753_v37  ;;  %v1756_v41 = vadd.f32 1.0, %v2478_v38 }
 0x6a7   :  { %v2482_v42 = vpop.eup %2481  ;;  %1794 = vst [vmem:[#allocation16 + $0x28] sm:$0xff] %v2480_v39 }
 0x6a8   :  { %2495 = vrcp.f32 %v1756_v41  ;;  %v1754_v43 = vadd.f32 1.0, %v2482_v42 }
 0x6a9   :  { %v2484_v44 = vpop.eup %2483 }
 0x6aa   :  { %1799 = vst [vmem:[#allocation16 + $0x50] sm:$0xff] %v2484_v44  ;;  %2497 = vrcp.f32 %v1754_v43 }
 0x6ab   :  { %v2486_v45 = vpop.eup %2485 }
 0x6ac   :  { %1797 = vst [vmem:[#allocation16 + $0x40] sm:$0xff] %v2486_v45 }
 0x6ad   :  { %v2488_v47 = vpop.eup %2487 }
 0x6ae   :  { %1800 = vst [vmem:[#allocation16 + $0x58] sm:$0xff] %v2488_v47 }
 0x6af   :  { %v2490_v48 = vpop.eup %2489 }
 0x6b0   :  { %1798 = vst [vmem:[#allocation16 + $0x48] sm:$0xff] %v2490_v48 }
 0x6b1   :  { %v2492_v49 = vpop.eup %2491 }
 0x6b2   :  { %1803 = vst [vmem:[#allocation16 + $0x70] sm:$0xff] %v2492_v49 }
 0x6b3   :  { %v2494_v51 = vpop.eup %2493 }
 0x6b4   :  { %1801 = vst [vmem:[#allocation16 + $0x60] sm:$0xff] %v2494_v51 }
 0x6b5   :  { %v2496_v36 = vpop.eup %2495 }
 0x6b6   :  { %1804 = vst [vmem:[#allocation16 + $0x78] sm:$0xff] %v2496_v36 }
 0x6b7   :  { %v2498_v58 = vpop.eup %2497 }
 0x6b8   :  { %1802 = vst [vmem:[#allocation16 + $0x68] sm:$0xff] %v2498_v58 }
 0x6b9   :  { %2670 = shalt.err (!%p2667_p2)
}
 0x6ba   :  { %s2702_s24 = smov 128   ;;  %s2703_s25 = smov 8  }
 0x6bb   :  { %1816 = dma.vmem_to_hbm [thread:$0]  %s1811_s22, 2048, %s3042_s12, [#allocation4], %s2702_s24, %s2702_s24, %s2703_s25  }
 0x6bc   :  { %2689 = dma.done.wait [#allocation4], 2048  }
 0x6bd   :  { %2690 = vsyncadd [#allocation4], 4294965248 }
 0x6be   :  { %1820 = vsyncpa [#allocation3], 1 }
 0x6bf   :  { %1821 = vsyncpa [#allocation6], 1 }
 0x6c0   :  { %1822 = vsyncpa [#allocation9], 1 }
 0x6c1   :  { %1823 = vsyncpa [#allocation12], 1 }
 0x6c2   :  { %1824 = vsyncpa [#allocation15], 1 }
 0x6c3   :  { %1825 = vsyncpa [#allocation4], 1 }

</bundles_post_ra>
